<compile_context>
chip_gen: v6e
topology: v6e:2x2x1
jax: 0.10.0
libtpu: 0.0.40
codegen_flags: <defaults>
</compile_context>

<pallas_src>
import jax
import jax.numpy as jnp
import numpy as np
from jax.experimental import pallas as pl
from jax.experimental.pallas import tpu as pltpu

BATCH_SIZE = 100            # hard-coded in the PyTorch module's forward()
IN_FEATURES = 12 * 8 * 8    # 768
DIMS = [IN_FEATURES, 120, 500, 84, 1]      # logical (PyTorch) dims
PAD = [IN_FEATURES, 128, 512, 128]         # lane-padded feature dims


def mlp_kernel(x_ref,
               w1_ref, b1_ref,
               w2_ref, b2_ref,
               w3_ref, b3_ref,
               w4_ref, b4_ref,
               o_ref):
    """Fused 4-layer MLP on the full (100, 768) bf16 batch, VMEM-resident."""
    # fc1..fc3: bf16 x bf16 MXU matmuls with f32 accumulation.
    h = jnp.dot(x_ref[...], w1_ref[...],
                preferred_element_type=jnp.float32) + b1_ref[...]
    h = jnp.maximum(h, 0.0)

    h = jnp.dot(h.astype(jnp.bfloat16), w2_ref[...],
                preferred_element_type=jnp.float32) + b2_ref[...]
    h = jnp.maximum(h, 0.0)

    h = jnp.dot(h.astype(jnp.bfloat16), w3_ref[...],
                preferred_element_type=jnp.float32) + b3_ref[...]
    h = jnp.maximum(h, 0.0)

    # fc4 (out_features == 1): VPU lane-wise multiply + cross-lane reduce
    # instead of a 1-column MXU matmul. w4 row is zero-padded, so padded
    # lanes contribute nothing.
    w4_row = w4_ref[...].astype(jnp.float32)              # (1, 128)
    o_ref[...] = (jnp.sum(h * w4_row, axis=-1, keepdims=True)
                  + b4_ref[0, 0]).astype(o_ref.dtype)


def init_params(key):
    """f32 params mimicking torch.nn.Linear defaults:
    U(-1/sqrt(fan_in), 1/sqrt(fan_in)) for both weight and bias.
    (The Kaiming loop in __init__ only touches Conv2d layers -> no-op.)"""
    params = []
    for i in range(4):
        fan_in, fan_out = DIMS[i], DIMS[i + 1]
        key, kw, kb = jax.random.split(key, 3)
        bound = 1.0 / np.sqrt(fan_in)
        w = jax.random.uniform(kw, (fan_in, fan_out), jnp.float32, -bound, bound)
        b = jax.random.uniform(kb, (fan_out,), jnp.float32, -bound, bound)
        params.append((w, b))
    return params


def pack_params(params_f32):
    """Zero-pad to lane-aligned shapes and cast weights to bf16."""
    (w1, b1), (w2, b2), (w3, b3), (w4, b4) = params_f32

    def pad_w(w, rows, cols):
        return jnp.pad(w, ((0, rows - w.shape[0]), (0, cols - w.shape[1])))

    def pad_b(b, cols):
        return jnp.pad(b, (0, cols - b.shape[0])).reshape(1, cols)

    return dict(
        w1=pad_w(w1, PAD[0], PAD[1]).astype(jnp.bfloat16),   # (768, 128)
        b1=pad_b(b1, PAD[1]),                                # (1, 128) f32
        w2=pad_w(w2, PAD[1], PAD[2]).astype(jnp.bfloat16),   # (128, 512)
        b2=pad_b(b2, PAD[2]),                                # (1, 512) f32
        w3=pad_w(w3, PAD[2], PAD[3]).astype(jnp.bfloat16),   # (512, 128)
        b3=pad_b(b3, PAD[3]),                                # (1, 128) f32
        w4=pad_w(w4.T, 1, PAD[3]).astype(jnp.bfloat16),      # (1, 128) row
        b4=b4.reshape(1, 1),                                 # (1, 1) f32 -> SMEM
    )


@jax.jit
def net_forward(x_nchw, p):
    """x_nchw: (100, 12, 8, 8) f32. p: packed/padded params dict."""
    B = x_nchw.shape[0]
    # Same as torch .view(B, -1); cast to bf16 fused with the reshape so x
    # crosses HBM->VMEM at half width. No batch padding: block = full array.
    x2d = x_nchw.reshape(B, -1).astype(jnp.bfloat16)

    # Advisory cost for XLA's scheduler (logical flops / actual bytes moved).
    flops = 2 * B * sum(DIMS[i] * DIMS[i + 1] for i in range(4))
    bytes_accessed = int(
        B * IN_FEATURES * 2                                   # x (bf16)
        + sum(int(np.prod(v.shape)) * v.dtype.itemsize for v in p.values())
        + B * 4)                                              # output (f32)

    in_specs = [
        pl.BlockSpec((B, PAD[0]),      lambda i: (0, 0)),     # x (full array)
        pl.BlockSpec((PAD[0], PAD[1]), lambda i: (0, 0)),     # w1
        pl.BlockSpec((1, PAD[1]),      lambda i: (0, 0)),     # b1
        pl.BlockSpec((PAD[1], PAD[2]), lambda i: (0, 0)),     # w2
        pl.BlockSpec((1, PAD[2]),      lambda i: (0, 0)),     # b2
        pl.BlockSpec((PAD[2], PAD[3]), lambda i: (0, 0)),     # w3
        pl.BlockSpec((1, PAD[3]),      lambda i: (0, 0)),     # b3
        pl.BlockSpec((1, PAD[3]),      lambda i: (0, 0)),     # w4 row
        pl.BlockSpec(memory_space=pltpu.MemorySpace.SMEM),    # b4 scalar
    ]
    out_spec = pl.BlockSpec((B, 1), lambda i: (0, 0))

    out = pl.pallas_call(
        mlp_kernel,
        out_shape=jax.ShapeDtypeStruct((B, 1), jnp.float32),
        grid=(1,),
        in_specs=in_specs,
        out_specs=out_spec,
        compiler_params=pltpu.CompilerParams(
            dimension_semantics=("arbitrary",)),
        cost_estimate=pl.CostEstimate(flops=flops, transcendentals=0,
                                      bytes_accessed=bytes_accessed),
    )(x2d, p["w1"], p["b1"], p["w2"], p["b2"],
      p["w3"], p["b3"], p["w4"], p["b4"])

    return out


def reference_forward(x_nchw, params_f32):
    """Pure-JAX f32 reference (matches the PyTorch semantics exactly)."""
    h = x_nchw.reshape(x_nchw.shape[0], -1)
    for i, (w, b) in enumerate(params_f32):
        h = h @ w + b
        if i < 3:
            h = jnp.maximum(h, 0.0)
    return h


if __name__ == "__main__":
    key = jax.random.PRNGKey(0)
    key, kx = jax.random.split(key)
    # Input consistent with fc1's 12*8*8 = 768 features: (100, 12, 8, 8) NCHW.
    x = jax.random.normal(kx, (BATCH_SIZE, 12, 8, 8), dtype=jnp.float32)

    params_f32 = init_params(key)
    packed = pack_params(params_f32)

    out = net_forward(x, packed)
    out = jax.block_until_ready(out)

    ref = reference_forward(x, params_f32)
    # bf16 weights + bf16 activations on the MXU -> loosen tolerance vs f32 ref.
    np.testing.assert_allclose(np.asarray(out), np.asarray(ref),
                               rtol=3e-2, atol=3e-2)
    assert out.shape == (BATCH_SIZE, 1)

    print("KERNEL_OK")
</pallas_src>

<mosaic_0001>
module attributes {stable_mosaic.version = 11 : i64} {
  func.func @mlp_kernel(%arg0: i32, %arg1: memref<100x768xbf16, #tpu.memory_space<vmem>>, %arg2: memref<768x128xbf16, #tpu.memory_space<vmem>>, %arg3: memref<1x128xf32, #tpu.memory_space<vmem>>, %arg4: memref<128x512xbf16, #tpu.memory_space<vmem>>, %arg5: memref<1x512xf32, #tpu.memory_space<vmem>>, %arg6: memref<512x128xbf16, #tpu.memory_space<vmem>>, %arg7: memref<1x128xf32, #tpu.memory_space<vmem>>, %arg8: memref<1x128xbf16, #tpu.memory_space<vmem>>, %arg9: memref<1x1xf32, #tpu.memory_space<smem>>, %arg10: memref<100x1xf32, #tpu.memory_space<vmem>>) attributes {dimension_semantics = [#tpu.dimension_semantics<arbitrary>], iteration_bounds = array<i64: 1>, scalar_prefetch = 0 : i64, scratch_operands = 0 : i64, tpu.core_type = #tpu.core_type<tc>, window_params = [{pipeline_mode = #tpu.pipeline_mode<synchronous>, transform_indices = @transform_0, window_bounds = array<i64: 100, 768>}, {pipeline_mode = #tpu.pipeline_mode<synchronous>, transform_indices = @transform_1, window_bounds = array<i64: 768, 128>}, {pipeline_mode = #tpu.pipeline_mode<synchronous>, transform_indices = @transform_2, window_bounds = array<i64: 1, 128>}, {pipeline_mode = #tpu.pipeline_mode<synchronous>, transform_indices = @transform_3, window_bounds = array<i64: 128, 512>}, {pipeline_mode = #tpu.pipeline_mode<synchronous>, transform_indices = @transform_4, window_bounds = array<i64: 1, 512>}, {pipeline_mode = #tpu.pipeline_mode<synchronous>, transform_indices = @transform_5, window_bounds = array<i64: 512, 128>}, {pipeline_mode = #tpu.pipeline_mode<synchronous>, transform_indices = @transform_6, window_bounds = array<i64: 1, 128>}, {pipeline_mode = #tpu.pipeline_mode<synchronous>, transform_indices = @transform_7, window_bounds = array<i64: 1, 128>}, {transform_indices = @transform_8, window_bounds = array<i64: 1, 1>}, {pipeline_mode = #tpu.pipeline_mode<synchronous>, transform_indices = @transform_9, window_bounds = array<i64: 100, 1>}]} {
    %c0 = arith.constant 0 : index
    %c0_0 = arith.constant 0 : index
    %0 = vector.load %arg1[%c0, %c0_0] : memref<100x768xbf16, #tpu.memory_space<vmem>>, vector<100x768xbf16>
    %c0_1 = arith.constant 0 : index
    %c0_2 = arith.constant 0 : index
    %1 = vector.load %arg2[%c0_1, %c0_2] : memref<768x128xbf16, #tpu.memory_space<vmem>>, vector<768x128xbf16>
    %cst = arith.constant dense<0.000000e+00> : vector<100x128xf32>
    %2 = tpu.matmul %0, %1, %cst {dimension_numbers = #tpu.dot_dimension_numbers<[1], [0], [0], [1], [0, 0, 1, 1], [], []>} : vector<100x768xbf16>, vector<768x128xbf16>, vector<100x128xf32> -> vector<100x128xf32>
    %c0_3 = arith.constant 0 : index
    %c0_4 = arith.constant 0 : index
    %3 = vector.load %arg3[%c0_3, %c0_4] : memref<1x128xf32, #tpu.memory_space<vmem>>, vector<1x128xf32>
    %4 = vector.broadcast %3 : vector<1x128xf32> to vector<100x128xf32>
    %5 = arith.addf %2, %4 : vector<100x128xf32>
    %cst_5 = arith.constant 0.000000e+00 : f32
    %6 = vector.broadcast %cst_5 : f32 to vector<100x128xf32>
    %7 = arith.maximumf %5, %6 : vector<100x128xf32>
    %8 = arith.truncf %7 : vector<100x128xf32> to vector<100x128xbf16>
    %c0_6 = arith.constant 0 : index
    %c0_7 = arith.constant 0 : index
    %9 = vector.load %arg4[%c0_6, %c0_7] : memref<128x512xbf16, #tpu.memory_space<vmem>>, vector<128x512xbf16>
    %cst_8 = arith.constant dense<0.000000e+00> : vector<100x512xf32>
    %10 = tpu.matmul %8, %9, %cst_8 {dimension_numbers = #tpu.dot_dimension_numbers<[1], [0], [0], [1], [0, 0, 1, 1], [], []>} : vector<100x128xbf16>, vector<128x512xbf16>, vector<100x512xf32> -> vector<100x512xf32>
    %c0_9 = arith.constant 0 : index
    %c0_10 = arith.constant 0 : index
    %11 = vector.load %arg5[%c0_9, %c0_10] : memref<1x512xf32, #tpu.memory_space<vmem>>, vector<1x512xf32>
    %12 = vector.broadcast %11 : vector<1x512xf32> to vector<100x512xf32>
    %13 = arith.addf %10, %12 : vector<100x512xf32>
    %cst_11 = arith.constant 0.000000e+00 : f32
    %14 = vector.broadcast %cst_11 : f32 to vector<100x512xf32>
    %15 = arith.maximumf %13, %14 : vector<100x512xf32>
    %16 = arith.truncf %15 : vector<100x512xf32> to vector<100x512xbf16>
    %c0_12 = arith.constant 0 : index
    %c0_13 = arith.constant 0 : index
    %17 = vector.load %arg6[%c0_12, %c0_13] : memref<512x128xbf16, #tpu.memory_space<vmem>>, vector<512x128xbf16>
    %cst_14 = arith.constant dense<0.000000e+00> : vector<100x128xf32>
    %18 = tpu.matmul %16, %17, %cst_14 {dimension_numbers = #tpu.dot_dimension_numbers<[1], [0], [0], [1], [0, 0, 1, 1], [], []>} : vector<100x512xbf16>, vector<512x128xbf16>, vector<100x128xf32> -> vector<100x128xf32>
    %c0_15 = arith.constant 0 : index
    %c0_16 = arith.constant 0 : index
    %19 = vector.load %arg7[%c0_15, %c0_16] : memref<1x128xf32, #tpu.memory_space<vmem>>, vector<1x128xf32>
    %20 = vector.broadcast %19 : vector<1x128xf32> to vector<100x128xf32>
    %21 = arith.addf %18, %20 : vector<100x128xf32>
    %cst_17 = arith.constant 0.000000e+00 : f32
    %22 = vector.broadcast %cst_17 : f32 to vector<100x128xf32>
    %23 = arith.maximumf %21, %22 : vector<100x128xf32>
    %c0_18 = arith.constant 0 : index
    %c0_19 = arith.constant 0 : index
    %24 = vector.load %arg8[%c0_18, %c0_19] : memref<1x128xbf16, #tpu.memory_space<vmem>>, vector<1x128xbf16>
    %25 = arith.extf %24 : vector<1x128xbf16> to vector<1x128xf32>
    %26 = vector.broadcast %25 : vector<1x128xf32> to vector<100x128xf32>
    %27 = arith.mulf %23, %26 : vector<100x128xf32>
    %cst_20 = arith.constant dense<0.000000e+00> : vector<100xf32>
    %28 = vector.multi_reduction <add>, %27, %cst_20 [1] : vector<100x128xf32> to vector<100xf32>
    %29 = vector.shape_cast %28 : vector<100xf32> to vector<100x1xf32>
    %c0_21 = arith.constant 0 : index
    %c0_22 = arith.constant 0 : index
    %30 = memref.load %arg9[%c0_21, %c0_22] : memref<1x1xf32, #tpu.memory_space<smem>>
    %31 = vector.broadcast %30 : f32 to vector<100x1xf32>
    %32 = arith.addf %29, %31 : vector<100x1xf32>
    %c0_23 = arith.constant 0 : index
    %c0_24 = arith.constant 0 : index
    %33 = vector.load %arg10[%c0_23, %c0_24] : memref<100x1xf32, #tpu.memory_space<vmem>>, vector<100x1xf32>
    tpu.vector_store %arg10[%c0_23, %c0_24], %32 {strides = array<i32>} : memref<100x1xf32, #tpu.memory_space<vmem>>, vector<100x1xf32>,
    return
  }
  func.func @transform_0(%arg0: i32) -> (i32, i32) {
    %c0_i32 = arith.constant 0 : i32
    %c0_i32_0 = arith.constant 0 : i32
    %c0_i32_1 = arith.constant 0 : i32
    return %c0_i32, %c0_i32_0 : i32, i32
  }
  func.func @transform_1(%arg0: i32) -> (i32, i32) {
    %c0_i32 = arith.constant 0 : i32
    %c0_i32_0 = arith.constant 0 : i32
    %c0_i32_1 = arith.constant 0 : i32
    return %c0_i32, %c0_i32_0 : i32, i32
  }
  func.func @transform_2(%arg0: i32) -> (i32, i32) {
    %c0_i32 = arith.constant 0 : i32
    %c0_i32_0 = arith.constant 0 : i32
    %c0_i32_1 = arith.constant 0 : i32
    return %c0_i32, %c0_i32_0 : i32, i32
  }
  func.func @transform_3(%arg0: i32) -> (i32, i32) {
    %c0_i32 = arith.constant 0 : i32
    %c0_i32_0 = arith.constant 0 : i32
    %c0_i32_1 = arith.constant 0 : i32
    return %c0_i32, %c0_i32_0 : i32, i32
  }
  func.func @transform_4(%arg0: i32) -> (i32, i32) {
    %c0_i32 = arith.constant 0 : i32
    %c0_i32_0 = arith.constant 0 : i32
    %c0_i32_1 = arith.constant 0 : i32
    return %c0_i32, %c0_i32_0 : i32, i32
  }
  func.func @transform_5(%arg0: i32) -> (i32, i32) {
    %c0_i32 = arith.constant 0 : i32
    %c0_i32_0 = arith.constant 0 : i32
    %c0_i32_1 = arith.constant 0 : i32
    return %c0_i32, %c0_i32_0 : i32, i32
  }
  func.func @transform_6(%arg0: i32) -> (i32, i32) {
    %c0_i32 = arith.constant 0 : i32
    %c0_i32_0 = arith.constant 0 : i32
    %c0_i32_1 = arith.constant 0 : i32
    return %c0_i32, %c0_i32_0 : i32, i32
  }
  func.func @transform_7(%arg0: i32) -> (i32, i32) {
    %c0_i32 = arith.constant 0 : i32
    %c0_i32_0 = arith.constant 0 : i32
    %c0_i32_1 = arith.constant 0 : i32
    return %c0_i32, %c0_i32_0 : i32, i32
  }
  func.func @transform_8(%arg0: i32) -> (i32, i32) {
    %c0_i32 = arith.constant 0 : i32
    %c0_i32_0 = arith.constant 0 : i32
    %c0_i32_1 = arith.constant 0 : i32
    return %c0_i32, %c0_i32_0 : i32, i32
  }
  func.func @transform_9(%arg0: i32) -> (i32, i32) {
    %c0_i32 = arith.constant 0 : i32
    %c0_i32_0 = arith.constant 0 : i32
    %c0_i32_1 = arith.constant 0 : i32
    return %c0_i32, %c0_i32_0 : i32, i32
  }
}

</mosaic_0001>

<bundles_post_ra>
// kernel: net_forward.1
= control target key start
LH: loop header
LB: loop body
LE: loop exit
PB: predicated region body
PF: predicated region fallthrough
CT: control target
= control target key end

     0   :  { %vm1940_vm0 = vcmask 1043456   ;;  %vm1959_vm1 = vcmask 7168   ;;  %vm1972_vm2 = vcmask 3072   ;;  %s3367_s1 = inlined_call_operand.vmem [shape: bf16[768,128], index: 1, kind: input, shape index: {}]   ;;  %s3368_s0 = inlined_call_operand.vmem [shape: bf16[100,768], index: 0, kind: input, shape index: {}]   ;;  %s3369_s3 = inlined_call_operand.vmem [shape: bf16[128,512], index: 3, kind: input, shape index: {}]   ;;  %s3370_s5 = inlined_call_operand.vmem [shape: bf16[512,128], index: 5, kind: input, shape index: {}]   ;;  %s3371_s2 = inlined_call_operand.vmem [shape: f32[1,128], index: 2, kind: input, shape index: {}]   ;;  %s3372_s4 = inlined_call_operand.vmem [shape: f32[1,512], index: 4, kind: input, shape index: {}]   ;;  %s3373_s7 = inlined_call_operand.vmem [shape: bf16[1,128], index: 7, kind: input, shape index: {}]   ;;  %s3374_s6 = inlined_call_operand.vmem [shape: f32[1,128], index: 6, kind: input, shape index: {}]   ;;  %s3375_s8 = inlined_call_operand.<no memory space> [shape: f32[1,1], index: 8, kind: input, shape index: {}]   ;;  %s3376_s9 = inlined_call_operand.vmem [shape: f32[100,1], index: 9, kind: output, shape index: {}]  }
   0x1   :  { %v2441_v0 = vld [vmem:[%s3367_s1 + $0x78] sm:$0xff]   ;;  %v2443_v2 = vld [vmem:[%s3367_s1 + $0x70] sm:$0xff]   ;;  %v2445_v4 = vld [vmem:[%s3367_s1 + $0x68] sm:$0xff]  }
   0x2   :  { %v2442_v1 = vld [vmem:[%s3367_s1 + $0x38] sm:$0xff]   ;;  %2134 = vmatprep.subr.bf16.mxu0 %v2441_v0  ;;  %2424 = vmatprep.subr.bf16.mxu1 %v2441_v0  ;;  %v2444_v3 = vld [vmem:[%s3367_s1 + $0x30] sm:$0xff]   ;;  %v2446_v5 = vld [vmem:[%s3367_s1 + $0x28] sm:$0xff]  }
   0x3   :  { %2135 = vmatpush3.bf16.msra.mxu0 %v2442_v1  ;;  %2432 = vmatpush3.bf16.msra.mxu1 %v2442_v1  ;;  %v2447_v6 = vld [vmem:[%s3367_s1 + $0x60] sm:$0xff]   ;;  %v2449_v8 = vld [vmem:[%s3367_s1 + $0x58] sm:$0xff]   ;;  %v2451_v10 = vld [vmem:[%s3367_s1 + $0x50] sm:$0xff]  }
   0x4   :  { %2136 = vmatprep.subr.bf16.mxu0 %v2443_v2  ;;  %2425 = vmatprep.subr.bf16.mxu1 %v2443_v2  ;;  %v2448_v7 = vld [vmem:[%s3367_s1 + $0x20] sm:$0xff]   ;;  %v2450_v9 = vld [vmem:[%s3367_s1 + $0x18] sm:$0xff]   ;;  %v2452_v13 = vld [vmem:[%s3367_s1 + $0x10] sm:$0xff]  }
   0x5   :  { %v2459_v11 = vld [vmem:[%s3368_s0 + $0x4] ss:$24 sps:$4 sm:$0xff]   ;;  %v2453_v14 = vld [vmem:[%s3367_s1 + $0x48] sm:$0xff]   ;;  %v2457_v19 = vld [vmem:[%s3368_s0] ss:$24 sps:$4 sm:$0xff]  }
   0x6   :  { %v2462_v12 = vld [vmem:[%s3368_s0 + $0xc4] ss:$24 sps:$4 sm:$0xff]   ;;  %697 = vmatprep.mubr.bf16.mxu0 %v2459_v11  ;;  %v2454_v15 = vld [vmem:[%s3367_s1 + $0x8] sm:$0xff]   ;;  %v2460_v20 = vld [vmem:[%s3368_s0 + $0xc0] ss:$24 sps:$4 sm:$0xff]  }
   0x7   :  { %2137 = vmatpush3.bf16.msra.mxu0 %v2444_v3  ;;  %2433 = vmatpush3.bf16.msra.mxu1 %v2444_v3  ;;  %v2455_v16 = vld [vmem:[%s3367_s1 + $0x40] sm:$0xff]   ;;  %v2463_v18 = vld [vmem:[%s3367_s1 + $0xf8] sm:$0xff]   ;;  %v2467_v24 = vld [vmem:[%s3367_s1 + $0xf0] sm:$0xff]  }
   0x8   :  { %2138 = vmatprep.subr.bf16.mxu0 %v2445_v4  ;;  %2426 = vmatprep.subr.bf16.mxu1 %v2445_v4  ;;  %v2456_v17 = vld [vmem:[%s3367_s1] sm:$0xff]   ;;  %v2464_v21 = vld [vmem:[%s3367_s1 + $0x178] sm:$0xff]   ;;  %v2468_v25 = vld [vmem:[%s3367_s1 + $0x170] sm:$0xff]  }
   0x9   :  { %729 = vmatprep.mubr.bf16.mxu1 %v2462_v12  ;;  %v2465_v22 = vld [vmem:[%s3367_s1 + $0xb8] sm:$0xff]   ;;  %v2471_v26 = vld [vmem:[%s3368_s0 + $0x34] ss:$24 sps:$4 sm:$0xff]   ;;  %v2473_v31 = vld [vmem:[%s3368_s0 + $0x30] ss:$24 sps:$4 sm:$0xff]  }
   0xa   :  { %v2466_v23 = vld [vmem:[%s3367_s1 + $0x138] sm:$0xff]   ;;  %v2469_v27 = vld [vmem:[%s3367_s1 + $0xb0] sm:$0xff]   ;;  %v2474_v30 = vld [vmem:[%s3367_s1 + $0xe8] sm:$0xff]  }
   0xb   :  { %2139 = vmatpush3.bf16.msra.mxu0 %v2446_v5  ;;  %2434 = vmatpush3.bf16.msra.mxu1 %v2446_v5  ;;  %v2476_v28 = vld [vmem:[%s3368_s0 + $0xf4] ss:$24 sps:$4 sm:$0xff]   ;;  %v2480_v35 = vld [vmem:[%s3368_s0 + $0xf0] ss:$24 sps:$4 sm:$0xff]   ;;  %v2481_v36 = vld [vmem:[%s3367_s1 + $0xe0] sm:$0xff]  }
   0xc   :  { %2140 = vmatprep.subr.bf16.mxu0 %v2447_v6  ;;  %2427 = vmatprep.subr.bf16.mxu1 %v2447_v6  ;;  %v2470_v29 = vld [vmem:[%s3367_s1 + $0x130] sm:$0xff]   ;;  %v2475_v32 = vld [vmem:[%s3367_s1 + $0x168] sm:$0xff]   ;;  %v2482_v37 = vld [vmem:[%s3367_s1 + $0x160] sm:$0xff]  }
   0xd   :  { %v2478_v33 = vld [vmem:[%s3367_s1 + $0xa8] sm:$0xff]   ;;  %v70_v38 = vld [vmem:[%s3368_s0 + $0x120] sm:$0x33]  ;;  %v2488_v43 = vld [vmem:[%s3367_s1 + $0xd8] sm:$0xff]  }
   0xe   :  { %v2479_v34 = vld [vmem:[%s3367_s1 + $0x128] sm:$0xff]   ;;  %v2483_v39 = vld [vmem:[%s3367_s1 + $0xa0] sm:$0xff]   ;;  %v2016_v41 = vcombine.high %v70_v38, %v70_v38  ;;  %v2489_v45 = vld [vmem:[%s3367_s1 + $0x158] sm:$0xff]   ;;  %v2015_v48 = vcombine.low %v70_v38, %v70_v38 }
   0xf   :  { %2141 = vmatpush3.bf16.msra.mxu0 %v2448_v7  ;;  %2435 = vmatpush3.bf16.msra.mxu1 %v2448_v7  ;;  %v2485_v40 = vld [vmem:[%s3368_s0 + $0x64] ss:$24 sps:$4 sm:$0xff]   ;;  %v2487_v44 = vld [vmem:[%s3368_s0 + $0x60] ss:$24 sps:$4 sm:$0xff]   ;;  %v2494_v49 = vld [vmem:[%s3367_s1 + $0xd0] sm:$0xff]  }
  0x10   :  { %2142 = vmatprep.subr.bf16.mxu0 %v2449_v8  ;;  %2428 = vmatprep.subr.bf16.mxu1 %v2449_v8  ;;  %v2484_v42 = vld [vmem:[%s3367_s1 + $0x120] sm:$0xff]   ;;  %v2491_v46 = vld [vmem:[%s3367_s1 + $0x98] sm:$0xff]   ;;  %v2495_v50 = vld [vmem:[%s3367_s1 + $0x150] sm:$0xff]  }
  0x11   :  { %v2492_v47 = vld [vmem:[%s3367_s1 + $0x118] sm:$0xff]   ;;  %v2496_v51 = vld [vmem:[%s3367_s1 + $0x90] sm:$0xff]   ;;  %v2501_v54 = vld [vmem:[%s3367_s1 + $0xc8] sm:$0xff]  }
  0x12   :  { %v2498_v52 = vld [vmem:[%s3368_s0 + $0x94] ss:$24 sps:$4 sm:$0xff]   ;;  %v2500_v55 = vld [vmem:[%s3368_s0 + $0x90] ss:$24 sps:$4 sm:$0xff]   ;;  %v2505_v59 = vld [vmem:[%s3367_s1 + $0xc0] sm:$0xff]  }
  0x13   :  { %2143 = vmatpush3.bf16.msra.mxu0 %v2450_v9  ;;  %2436 = vmatpush3.bf16.msra.mxu1 %v2450_v9  ;;  %v2497_v53 = vld [vmem:[%s3367_s1 + $0x110] sm:$0xff]   ;;  %v2502_v56 = vld [vmem:[%s3367_s1 + $0x148] sm:$0xff]   ;;  %v2506_v60 = vld [vmem:[%s3367_s1 + $0x140] sm:$0xff]  }
  0x14   :  { %2144 = vmatprep.subr.bf16.mxu0 %v2451_v10  ;;  %2429 = vmatprep.subr.bf16.mxu1 %v2451_v10  ;;  %v2503_v57 = vld [vmem:[%s3367_s1 + $0x88] sm:$0xff]   ;;  %v2507_v62 = vld [vmem:[%s3367_s1 + $0x80] sm:$0xff]   ;;  %v2515_v3 = vld [vmem:[%s3368_s0 + $0x3c] ss:$24 sps:$4 sm:$0xff]  }
  0x15   :  { %v2504_v58 = vld [vmem:[%s3367_s1 + $0x108] sm:$0xff]   ;;  %v2508_v0 = vld [vmem:[%s3367_s1 + $0x100] sm:$0xff]   ;;  %v2519_v5 = vld [vmem:[%s3368_s0 + $0x38] ss:$24 sps:$4 sm:$0xff]  }
  0x16   :  { %v2511_v61 = vld [vmem:[%s3368_s0 + $0xc] ss:$24 sps:$4 sm:$0xff]   ;;  %v2509_v1 = vld [vmem:[%s3368_s0 + $0x8] ss:$24 sps:$4 sm:$0xff]  }
  0x17   :  { %2145 = vmatpush3.bf16.msra.mxu0 %v2452_v13  ;;  %2437 = vmatpush3.bf16.msra.mxu1 %v2452_v13  ;;  %v2514_v63 = vld [vmem:[%s3368_s0 + $0x14] ss:$24 sps:$4 sm:$0xff]   ;;  %v2512_v2 = vld [vmem:[%s3368_s0 + $0x10] ss:$24 sps:$4 sm:$0xff]   ;;  %v2517_v4 = vld [vmem:[%s3368_s0 + $0x44] ss:$24 sps:$4 sm:$0xff]  }
  0x18   :  { %2146 = vmatprep.subr.bf16.mxu0 %v2453_v14  ;;  %2430 = vmatprep.subr.bf16.mxu1 %v2453_v14  ;;  %v2520_v6 = vld [vmem:[%s3368_s0 + $0x40] ss:$24 sps:$4 sm:$0xff]   ;;  %v2521_v7 = vld [vmem:[%s3368_s0 + $0x6c] ss:$24 sps:$4 sm:$0xff]   ;;  %v2526_v14 = vld [vmem:[%s3368_s0 + $0x70] ss:$24 sps:$4 sm:$0xff]  }
  0x19   :  { %v2523_v8 = vld [vmem:[%s3368_s0 + $0x74] ss:$24 sps:$4 sm:$0xff]   ;;  %v2549_v9 = vld [vmem:[%s3369_s3 + $0xe0] ss:$16 sps:$4 sm:$0xff]   ;;  %v2552_v11 = vld [vmem:[%s3369_s3 + $0xe8] ss:$16 sps:$4 sm:$0xff]  }
  0x1a   :  { %v2551_v10 = vld [vmem:[%s3369_s3 + $0xe4] ss:$16 sps:$4 sm:$0xff]   ;;  %v2554_v12 = vld [vmem:[%s3369_s3 + $0xec] ss:$16 sps:$4 sm:$0xff]   ;;  %v2525_v13 = vld [vmem:[%s3368_s0 + $0x68] ss:$24 sps:$4 sm:$0xff]  }
  0x1b   :  { %2147 = vmatpush3.bf16.msra.mxu0 %v2454_v15  ;;  %2438 = vmatpush3.bf16.msra.mxu1 %v2454_v15  ;;  %v2555_v15 = vld [vmem:[%s3369_s3 + $0xc0] ss:$16 sps:$4 sm:$0xff]   ;;  %v2566_v38 = vld [vmem:[%s3369_s3 + $0xac] ss:$16 sps:$4 sm:$0xff]  }
  0x1c   :  { %2148 = vmatprep.subr.bf16.mxu0 %v2455_v16  ;;  %2431 = vmatprep.subr.bf16.mxu1 %v2455_v16  ;;  %v2557_v16 = vld [vmem:[%s3369_s3 + $0xc4] ss:$16 sps:$4 sm:$0xff]  }
  0x1f   :  { %2149 = vmatpush3.bf16.msra.mxu0 %v2456_v17  ;;  %2439 = vmatpush3.bf16.msra.mxu1 %v2456_v17  ;;  %v2527_v17 = vld [vmem:[%s3368_s0 + $0x9c] ss:$24 sps:$4 sm:$0xff]  }
  0x20   :  { %2192 = vmatprep.subr.bf16.mxu1 %v2463_v18  ;;  %2250 = vmatprep.subr.bf16.mxu0 %v2464_v21  ;;  %v2529_v18 = vld [vmem:[%s3368_s0 + $0xa4] ss:$24 sps:$4 sm:$0xff]  }
  0x21   :  { %v2533_v21 = vld [vmem:[%s3368_s0 + $0xcc] ss:$24 sps:$4 sm:$0xff]  }
  0x22   :  { %698 = vmatmul.mubr.bf16.vlgmr.msra.gmra.mxu0 %v2457_v19  ;;  %730 = vmatmul.mubr.bf16.vlgmr.msra.gmra.mxu1 %v2460_v20  ;;  %v2531_v19 = vld [vmem:[%s3368_s0 + $0x98] ss:$24 sps:$4 sm:$0xff]  }
  0x23   :  { %2193 = vmatpush3.bf16.msra.mxu1 %v2465_v22  ;;  %2251 = vmatpush3.bf16.msra.mxu0 %v2466_v23  ;;  %v2532_v20 = vld [vmem:[%s3368_s0 + $0xa0] ss:$24 sps:$4 sm:$0xff]   ;;  %v2535_v22 = vld [vmem:[%s3368_s0 + $0xd4] ss:$24 sps:$4 sm:$0xff]  }
  0x24   :  { %2194 = vmatprep.subr.bf16.mxu1 %v2467_v24  ;;  %2252 = vmatprep.subr.bf16.mxu0 %v2468_v25  ;;  %v2537_v23 = vld [vmem:[%s3368_s0 + $0xc8] ss:$24 sps:$4 sm:$0xff]   ;;  %v2539_v25 = vld [vmem:[%s3368_s0 + $0xfc] ss:$24 sps:$4 sm:$0xff]  }
  0x25   :  { %705 = vmatprep.mubr.bf16.mxu0 %v2471_v26  ;;  %737 = vmatprep.mubr.bf16.mxu1 %v2476_v28  ;;  %v2538_v24 = vld [vmem:[%s3368_s0 + $0xd0] ss:$24 sps:$4 sm:$0xff]   ;;  %v2541_v26 = vld [vmem:[%s3368_s0 + $0x104] ss:$24 sps:$4 sm:$0xff]  }
  0x26   :  { %v2560_v28 = vld [vmem:[%s3369_s3 + $0xcc] ss:$16 sps:$4 sm:$0xff]  }
  0x27   :  { %2195 = vmatpush3.bf16.msra.mxu1 %v2469_v27  ;;  %2253 = vmatpush3.bf16.msra.mxu0 %v2470_v29  ;;  %v2558_v27 = vld [vmem:[%s3369_s3 + $0xc8] ss:$16 sps:$4 sm:$0xff]  }
  0x28   :  { %2196 = vmatprep.subr.bf16.mxu1 %v2474_v30  ;;  %2254 = vmatprep.subr.bf16.mxu0 %v2475_v32  ;;  %v71_v29 = vld [vmem:[%s3368_s0 + $0x128] sm:$0x33]  ;;  %v72_v30 = vld [vmem:[%s3368_s0 + $0x130] sm:$0x33]  ;;  %v2544_v32 = vld [vmem:[%s3368_s0 + $0x100] ss:$24 sps:$4 sm:$0xff]  }
  0x2a   :  { %706 = vmatmul.mubr.bf16.gmra.mxu0 %v2473_v31  ;;  %738 = vmatmul.mubr.bf16.gmra.mxu1 %v2480_v35  ;;  %v2543_v31 = vld [vmem:[%s3368_s0 + $0xf8] ss:$24 sps:$4 sm:$0xff]  }
  0x2b   :  { %2197 = vmatpush3.bf16.msra.mxu1 %v2478_v33  ;;  %2255 = vmatpush3.bf16.msra.mxu0 %v2479_v34  ;;  %v2018_v33 = vcombine.high %v71_v29, %v71_v29  ;;  %v2020_v34 = vcombine.high %v72_v30, %v72_v30  ;;  %v2561_v35 = vld [vmem:[%s3369_s3 + $0xa0] ss:$16 sps:$4 sm:$0xff]  }
  0x2c   :  { %2198 = vmatprep.subr.bf16.mxu1 %v2481_v36  ;;  %2256 = vmatprep.subr.bf16.mxu0 %v2482_v37  ;;  %v2563_v36 = vld [vmem:[%s3369_s3 + $0xa4] ss:$16 sps:$4 sm:$0xff]   ;;  %v2564_v37 = vld [vmem:[%s3369_s3 + $0xa8] ss:$16 sps:$4 sm:$0xff]  }
  0x2d   :  { %713 = vmatprep.mubr.bf16.mxu0 %v2485_v40  ;;  %745 = vmatprep.mubr.bf16.mxu1 %v2016_v41  ;;  %v2019_v40 = vcombine.low %v72_v30, %v72_v30  ;;  %v2567_v41 = vld [vmem:[%s3369_s3 + $0x80] ss:$16 sps:$4 sm:$0xff]  }
  0x2f   :  { %2199 = vmatpush3.bf16.msra.mxu1 %v2483_v39  ;;  %2257 = vmatpush3.bf16.msra.mxu0 %v2484_v42  ;;  %v2017_v39 = vcombine.low %v71_v29, %v71_v29  ;;  %v2569_v42 = vld [vmem:[%s3369_s3 + $0x84] ss:$16 sps:$4 sm:$0xff]  }
  0x30   :  { %2200 = vmatprep.subr.bf16.mxu1 %v2488_v43  ;;  %2258 = vmatprep.subr.bf16.mxu0 %v2489_v45  ;;  %v2570_v43 = vld [vmem:[%s3369_s3 + $0x88] ss:$16 sps:$4 sm:$0xff]   ;;  %v2573_v45 = vld [vmem:[%s3369_s3 + $0x60] ss:$16 sps:$4 sm:$0xff]  }
  0x32   :  { %714 = vmatmul.mubr.bf16.gmra.mxu0 %v2487_v44  ;;  %746 = vmatmul.mubr.bf16.gmra.mxu1 %v2015_v48  ;;  %v2572_v44 = vld [vmem:[%s3369_s3 + $0x8c] ss:$16 sps:$4 sm:$0xff]  }
  0x33   :  { %2201 = vmatpush3.bf16.msra.mxu1 %v2491_v46  ;;  %2259 = vmatpush3.bf16.msra.mxu0 %v2492_v47  ;;  %v2575_v46 = vld [vmem:[%s3369_s3 + $0x64] ss:$16 sps:$4 sm:$0xff]   ;;  %v2576_v47 = vld [vmem:[%s3369_s3 + $0x68] ss:$16 sps:$4 sm:$0xff]   ;;  %v2578_v48 = vld [vmem:[%s3369_s3 + $0x6c] ss:$16 sps:$4 sm:$0xff]  }
  0x34   :  { %2202 = vmatprep.subr.bf16.mxu1 %v2494_v49  ;;  %2260 = vmatprep.subr.bf16.mxu0 %v2495_v50  ;;  %v2579_v49 = vld [vmem:[%s3369_s3 + $0x40] ss:$16 sps:$4 sm:$0xff]   ;;  %v2581_v50 = vld [vmem:[%s3369_s3 + $0x44] ss:$16 sps:$4 sm:$0xff]  }
  0x35   :  { %721 = vmatprep.mubr.bf16.mxu0 %v2498_v52  ;;  %785 = vmatprep.mubr.bf16.mxu1 %v2511_v61  ;;  %v2584_v52 = vld [vmem:[%s3369_s3 + $0x4c] ss:$16 sps:$4 sm:$0xff]   ;;  %v2629_v61 = vmov 0  }
  0x37   :  { %2203 = vmatpush3.bf16.msra.mxu1 %v2496_v51  ;;  %2261 = vmatpush3.bf16.msra.mxu0 %v2497_v53  ;;  %v2582_v51 = vld [vmem:[%s3369_s3 + $0x48] ss:$16 sps:$4 sm:$0xff]   ;;  %v2587_v53 = vld [vmem:[%s3369_s3 + $0x24] ss:$16 sps:$4 sm:$0xff]  }
  0x38   :  { %2204 = vmatprep.subr.bf16.mxu1 %v2501_v54  ;;  %2262 = vmatprep.subr.bf16.mxu0 %v2502_v56  ;;  %v2590_v54 = vld [vmem:[%s3369_s3 + $0x2c] ss:$16 sps:$4 sm:$0xff]   ;;  %v2588_v56 = vld [vmem:[%s3369_s3 + $0x28] ss:$16 sps:$4 sm:$0xff]  }
  0x3a   :  { %722 = vmatmul.mubr.bf16.gmra.mxu0 %v2500_v55  ;;  %v2585_v55 = vld [vmem:[%s3369_s3 + $0x20] ss:$16 sps:$4 sm:$0xff]  }
  0x3b   :  { %2205 = vmatpush3.bf16.msra.mxu1 %v2503_v57  ;;  %2263 = vmatpush3.bf16.msra.mxu0 %v2504_v58  ;;  %v2593_v57 = vld [vmem:[%s3369_s3 + $0x4] ss:$16 sps:$4 sm:$0xff]   ;;  %v2596_v58 = vld [vmem:[%s3369_s3 + $0xc] ss:$16 sps:$4 sm:$0xff]  }
  0x3c   :  { %2206 = vmatprep.subr.bf16.mxu1 %v2505_v59  ;;  %2264 = vmatprep.subr.bf16.mxu0 %v2506_v60  ;;  %v2591_v59 = vld [vmem:[%s3369_s3] ss:$16 sps:$4 sm:$0xff]   ;;  %v2594_v60 = vld [vmem:[%s3369_s3 + $0x8] ss:$16 sps:$4 sm:$0xff]  }
  0x3d   :  { %873 = vmatprep.mubr.bf16.mxu0 %v2514_v63  ;;  %v2599_v63 = vld [vmem:[%s3370_s5 + $0xf8] sm:$0xff]  }
  0x3f   :  { %2207 = vmatpush3.bf16.msra.mxu1 %v2507_v62  ;;  %2265 = vmatpush3.bf16.msra.mxu0 %v2508_v0  ;;  %v2597_v62 = vld [vmem:[%s3370_s5 + $0x78] sm:$0xff]  }
  0x40   :  { %1163 = vmatprep.subr.bf16.mxu1 %v2551_v10  ;;  %1264 = vmatprep.subr.bf16.mxu0 %v2554_v12 }
  0x42   :  { %786 = vmatmul.mubr.bf16.vlgmr.msra.gmra.mxu1 %v2509_v1  ;;  %874 = vmatmul.mubr.bf16.vlgmr.msra.gmra.mxu0 %v2512_v2 }
  0x43   :  { %793 = vmatprep.mubr.bf16.mxu1 %v2515_v3  ;;  %881 = vmatprep.mubr.bf16.mxu0 %v2517_v4 }
  0x44   :  { %1164 = vmatpush1.bf16.msra.mxu1 %v2549_v9  ;;  %1265 = vmatpush1.bf16.msra.mxu0 %v2552_v11 }
  0x45   :  { %1165 = vmatprep.subr.bf16.mxu1 %v2557_v16  ;;  %1266 = vmatprep.subr.bf16.mxu0 %v2560_v28 }
  0x48   :  { %1166 = vmatpush1.bf16.msra.mxu1 %v2555_v15  ;;  %1267 = vmatpush1.bf16.msra.mxu0 %v2558_v27 }
  0x49   :  { %1167 = vmatprep.subr.bf16.mxu1 %v2563_v36  ;;  %1268 = vmatprep.subr.bf16.mxu0 %v2566_v38 }
  0x4a   :  { %794 = vmatmul.mubr.bf16.gmra.mxu1 %v2519_v5  ;;  %882 = vmatmul.mubr.bf16.gmra.mxu0 %v2520_v6 }
  0x4b   :  { %801 = vmatprep.mubr.bf16.mxu1 %v2521_v7  ;;  %889 = vmatprep.mubr.bf16.mxu0 %v2523_v8 }
  0x4c   :  { %1168 = vmatpush1.bf16.msra.mxu1 %v2561_v35  ;;  %1269 = vmatpush1.bf16.msra.mxu0 %v2564_v37 }
  0x4d   :  { %1169 = vmatprep.subr.bf16.mxu1 %v2569_v42  ;;  %1270 = vmatprep.subr.bf16.mxu0 %v2572_v44 }
  0x50   :  { %1170 = vmatpush1.bf16.msra.mxu1 %v2567_v41  ;;  %1271 = vmatpush1.bf16.msra.mxu0 %v2570_v43 }
  0x51   :  { %1171 = vmatprep.subr.bf16.mxu1 %v2575_v46  ;;  %1272 = vmatprep.subr.bf16.mxu0 %v2578_v48 }
  0x52   :  { %802 = vmatmul.mubr.bf16.gmra.mxu1 %v2525_v13  ;;  %890 = vmatmul.mubr.bf16.gmra.mxu0 %v2526_v14 }
  0x53   :  { %809 = vmatprep.mubr.bf16.mxu1 %v2527_v17  ;;  %897 = vmatprep.mubr.bf16.mxu0 %v2529_v18 }
  0x54   :  { %1172 = vmatpush1.bf16.msra.mxu1 %v2573_v45  ;;  %1273 = vmatpush1.bf16.msra.mxu0 %v2576_v47 }
  0x55   :  { %1173 = vmatprep.subr.bf16.mxu1 %v2581_v50  ;;  %1274 = vmatprep.subr.bf16.mxu0 %v2584_v52 }
  0x58   :  { %1174 = vmatpush1.bf16.msra.mxu1 %v2579_v49  ;;  %1275 = vmatpush1.bf16.msra.mxu0 %v2582_v51 }
  0x59   :  { %1175 = vmatprep.subr.bf16.mxu1 %v2587_v53  ;;  %1276 = vmatprep.subr.bf16.mxu0 %v2590_v54 }
  0x5a   :  { %810 = vmatmul.mubr.bf16.gmra.mxu1 %v2531_v19  ;;  %898 = vmatmul.mubr.bf16.gmra.mxu0 %v2532_v20 }
  0x5b   :  { %817 = vmatprep.mubr.bf16.mxu1 %v2533_v21  ;;  %905 = vmatprep.mubr.bf16.mxu0 %v2535_v22 }
  0x5c   :  { %1176 = vmatpush1.bf16.msra.mxu1 %v2585_v55  ;;  %1277 = vmatpush1.bf16.msra.mxu0 %v2588_v56 }
  0x5d   :  { %1177 = vmatprep.subr.bf16.mxu1 %v2593_v57  ;;  %1278 = vmatprep.subr.bf16.mxu0 %v2596_v58 }
  0x60   :  { %1178 = vmatpush1.bf16.msra.mxu1 %v2591_v59  ;;  %1279 = vmatpush1.bf16.msra.mxu0 %v2594_v60 }
  0x61   :  { %2308 = vmatprep.subr.bf16.mxu1 %v2597_v62  ;;  %2366 = vmatprep.subr.bf16.mxu0 %v2599_v63 }
  0x62   :  { %818 = vmatmul.mubr.bf16.gmra.mxu1 %v2537_v23  ;;  %906 = vmatmul.mubr.bf16.gmra.mxu0 %v2538_v24 }
  0x63   :  { %825 = vmatprep.mubr.bf16.mxu1 %v2539_v25  ;;  %913 = vmatprep.mubr.bf16.mxu0 %v2541_v26 }
  0x6a   :  { %826 = vmatmul.mubr.bf16.gmra.mxu1 %v2543_v31  ;;  %914 = vmatmul.mubr.bf16.gmra.mxu0 %v2544_v32  ;;  %v3074_v32 = vld [vmem:[%s3371_s2] ss:$0 sm:$0xff] }
  0x6b   :  { %833 = vmatprep.mubr.bf16.mxu1 %v2018_v33  ;;  %921 = vmatprep.mubr.bf16.mxu0 %v2020_v34 }
  0x72   :  { %834 = vmatmul.mubr.bf16.gmra.mxu1 %v2017_v39  ;;  %922 = vmatmul.mubr.bf16.gmra.mxu0 %v2019_v40 }
  0x73   :  { %1195 = vmatprep.mubr.bf16.mxu1 %v2629_v61  ;;  %1296 = vmatprep.mubr.bf16.mxu0 %v2629_v61 }
  0xe2   :  { %v2150_v0 = vpop.f32.mrf.mxu0  ;;  %v2174_v1 = vpop.f32.mrf.mxu1 }
  0xe4   :  { %v2151_v2 = vpop.f32.mrf.mxu0  ;;  %v2175_v3 = vpop.f32.mrf.mxu1 }
  0xe5   :  { %v3045_v4 = vadd.f32 %v2175_v3, %v2174_v1  ;;  %v2152_v31 = vadd.f32 %v2151_v2, %v2150_v0 }
  0xe6   :  { %v2153_v5 = vpop.f32.mrf.mxu0  ;;  %v3047_v6 = vpop.f32.mrf.mxu1 }
  0xe7   :  { %v700_v37 = vadd.f32 %v2152_v31, %v3074_v32 }
  0xe8   :  { %v2154_v7 = vpop.f32.mrf.mxu0  ;;  %v3049_v8 = vpop.f32.mrf.mxu1 }
  0xe9   :  { %v2155_v38 = vadd.f32 %v2154_v7, %v2153_v5 }
  0xea   :  { %v2156_v9 = vpop.f32.mrf.mxu0  ;;  %v2180_v10 = vpop.f32.mrf.mxu1 }
  0xeb   :  { %v703_v45 = vadd.f32 %v2155_v38, %v3074_v32  ;;  %v2602_v38 = vld [vmem:[%s3370_s5 + $0x30] sm:$0xff]  }
  0xec   :  { %v2157_v11 = vpop.f32.mrf.mxu0  ;;  %v2181_v12 = vpop.f32.mrf.mxu1 }
  0xed   :  { %v3051_v13 = vadd.f32 %v2181_v12, %v2180_v10  ;;  %v2158_v46 = vadd.f32 %v2157_v11, %v2156_v9  ;;  %v2598_v12 = vld [vmem:[%s3370_s5 + $0x38] sm:$0xff]  }
  0xee   :  { %v2159_v14 = vpop.f32.mrf.mxu0  ;;  %v3053_v15 = vpop.f32.mrf.mxu1 }
  0xef   :  { %v708_v56 = vadd.f32 %v2158_v46, %v3074_v32 }
  0xf0   :  { %v2160_v16 = vpop.f32.mrf.mxu0  ;;  %v3055_v17 = vpop.f32.mrf.mxu1 }
  0xf1   :  { %v2161_v57 = vadd.f32 %v2160_v16, %v2159_v14  ;;  %v2600_v14 = vld [vmem:[%s3370_s5 + $0xb8] sm:$0xff]  }
  0xf2   :  { %v2162_v18 = vpop.f32.mrf.mxu0  ;;  %v2186_v19 = vpop.f32.mrf.mxu1 }
  0xf3   :  { %v711_v7 = vadd.f32 %v2161_v57, %v3074_v32 }
  0xf4   :  { %v2163_v20 = vpop.f32.mrf.mxu0  ;;  %v2187_v21 = vpop.f32.mrf.mxu1 }
  0xf5   :  { %v3057_v22 = vadd.f32 %v2187_v21, %v2186_v19  ;;  %v2164_v2 = vadd.f32 %v2163_v20, %v2162_v18  ;;  %v2601_v18 = vld [vmem:[%s3370_s5 + $0x70] sm:$0xff]  }
  0xf6   :  { %v3059_v23 = vpop.f32.mrf.mxu0  ;;  %v2189_v24 = vpop.f32.mrf.mxu1  ;;  %v2603_v20 = vld [vmem:[%s3370_s5 + $0xf0] sm:$0xff]  }
  0xf7   :  { %v716_v31 = vadd.f32 %v2164_v2, %v3074_v32  ;;  %v2610_v2 = vld [vmem:[%s3370_s5 + $0x20] sm:$0xff]  }
  0xf8   :  { %v3061_v25 = vpop.f32.mrf.mxu0  ;;  %v2190_v26 = vpop.f32.mrf.mxu1 }
  0xfa   :  { %v3063_v27 = vpop.f32.mrf.mxu0 }
  0xfc   :  { %v3065_v28 = vpop.f32.mrf.mxu0 }
  0xfe   :  { %v3067_v29 = vpop.f32.mrf.mxu0 }
 0x100   :  { %v3069_v30 = vpop.f32.mrf.mxu0 }
 0x102   :  { %v2208_v33 = vpop.f32.mrf.mxu1  ;;  %v2266_v34 = vpop.f32.mrf.mxu0 }
 0x104   :  { %v2209_v35 = vpop.f32.mrf.mxu1  ;;  %v2267_v36 = vpop.f32.mrf.mxu0 }
 0x105   :  { %v2210_v39 = vadd.f32 %v2209_v35, %v2208_v33  ;;  %v2268_v47 = vadd.f32 %v2267_v36, %v2266_v34  ;;  %v2167_v35 = vadd.f32 %v3061_v25, %v3059_v23  ;;  %v2605_v23 = vld [vmem:[%s3370_s5 + $0x68] sm:$0xff]  }
 0x106   :  { %v2211_v40 = vpop.f32.mrf.mxu1  ;;  %v2269_v41 = vpop.f32.mrf.mxu0 }
 0x107   :  { %v788_v42 = vadd.f32 %v2210_v39, %v700_v37 }
 0x108   :  { %v2212_v43 = vpop.f32.mrf.mxu1  ;;  %v2270_v44 = vpop.f32.mrf.mxu0 }
 0x109   :  { %v2213_v48 = vadd.f32 %v2212_v43, %v2211_v40  ;;  %v876_v51 = vadd.f32 %v2268_v47, %v788_v42  ;;  %v2271_v53 = vadd.f32 %v2270_v44, %v2269_v41  ;;  %v2604_v41 = vld [vmem:[%s3370_s5 + $0xb0] sm:$0xff]   ;;  %v2170_v44 = vadd.f32 %v3065_v28, %v3063_v27  ;;  %v2608_v27 = vld [vmem:[%s3370_s5 + $0xa8] sm:$0xff]   ;;  %v2609_v28 = vld [vmem:[%s3370_s5 + $0x60] sm:$0xff]  }
 0x10a   :  { %v2214_v49 = vpop.f32.mrf.mxu1  ;;  %v2272_v50 = vpop.f32.mrf.mxu0  ;;  %v719_v47 = vadd.f32 %v2167_v35, %v3074_v32 }
 0x10b   :  { %v791_v52 = vadd.f32 %v2213_v48, %v703_v45  ;;  %v929_v63 = vmax.f32 %v876_v51, 0.0  ;;  %v2606_v51 = vld [vmem:[%s3370_s5 + $0x28] sm:$0xff]  }
 0x10c   :  { %v2215_v54 = vpop.f32.mrf.mxu1  ;;  %v2273_v55 = vpop.f32.mrf.mxu0 }
 0x10d   :  { %v879_v58 = vadd.f32 %v2271_v53, %v791_v52  ;;  %v2216_v59 = vadd.f32 %v2215_v54, %v2214_v49  ;;  %v2274_v10 = vadd.f32 %v2273_v55, %v2272_v50  ;;  %v2607_v52 = vld [vmem:[%s3370_s5 + $0xe8] sm:$0xff]  }
 0x10e   :  { %v2217_v60 = vpop.f32.mrf.mxu1  ;;  %v2275_v62 = vpop.f32.mrf.mxu0 }
 0x10f   :  { %v930_v0 = vmax.f32 %v879_v58, 0.0  ;;  %v796_v1 = vadd.f32 %v2216_v59, %v708_v56  ;;  %v2611_v58 = vld [vmem:[%s3370_s5 + $0xe0] sm:$0xff]   ;;  %v724_v59 = vadd.f32 %v2170_v44, %v3074_v32 }
 0x110   :  { %v2218_v3 = vpop.f32.mrf.mxu1  ;;  %v2276_v5 = vpop.f32.mrf.mxu0 }
 0x111   :  { %v942_v9 = vpack.c.bf16 %v930_v0, %v929_v63  ;;  %v2219_v11 = vadd.f32 %v2218_v3, %v2217_v60  ;;  %v884_v21 = vadd.f32 %v2274_v10, %v796_v1  ;;  %v2277_v26 = vadd.f32 %v2276_v5, %v2275_v62 }
 0x112   :  { %v2220_v16 = vpop.f32.mrf.mxu1  ;;  %v2278_v19 = vpop.f32.mrf.mxu0  ;;  %v2173_v63 = vadd.f32 %v3069_v30, %v3067_v29  ;;  %v2613_v29 = vld [vmem:[%s3370_s5 + $0x58] sm:$0xff]  }
 0x113   :  { %v799_v24 = vadd.f32 %v2219_v11, %v711_v7  ;;  %1196 = vmatmul.mubr.bf16.vlgmr.msra.gmra.mxu1 %v942_v9  ;;  %1297 = vmatmul.mubr.bf16.vlgmr.msra.gmra.mxu0 %v942_v9  ;;  %v931_v25 = vmax.f32 %v884_v21, 0.0  ;;  %v2612_v7 = vld [vmem:[%s3370_s5 + $0xa0] sm:$0xff]   ;;  %v2615_v21 = vld [vmem:[%s3370_s5 + $0xd8] sm:$0xff]  }
 0x114   :  { %v2221_v33 = vpop.f32.mrf.mxu1  ;;  %v2279_v34 = vpop.f32.mrf.mxu0  ;;  %1205 = vmatprep.mubr.bf16.mxu1 %v2629_v61  ;;  %1306 = vmatprep.mubr.bf16.mxu0 %v2629_v61 }
 0x115   :  { %v887_v36 = vadd.f32 %v2277_v26, %v799_v24  ;;  %v2222_v37 = vadd.f32 %v2221_v33, %v2220_v16  ;;  %2309 = vmatpush3.bf16.msra.mxu1 %v2598_v12  ;;  %2367 = vmatpush3.bf16.msra.mxu0 %v2600_v14  ;;  %v2280_v48 = vadd.f32 %v2279_v34, %v2278_v19  ;;  %v2617_v33 = vld [vmem:[%s3370_s5 + $0x50] sm:$0xff]  }
 0x116   :  { %v2223_v39 = vpop.f32.mrf.mxu1  ;;  %v2281_v40 = vpop.f32.mrf.mxu0  ;;  %2310 = vmatprep.subr.bf16.mxu1 %v2601_v18  ;;  %2368 = vmatprep.subr.bf16.mxu0 %v2603_v20  ;;  %v727_v14 = vadd.f32 %v2173_v63, %v3074_v32  ;;  %v2614_v20 = vld [vmem:[%s3370_s5 + $0x18] sm:$0xff]  }
 0x117   :  { %v932_v42 = vmax.f32 %v887_v36, 0.0  ;;  %v804_v43 = vadd.f32 %v2222_v37, %v716_v31  ;;  %v2616_v31 = vld [vmem:[%s3370_s5 + $0x98] sm:$0xff]   ;;  %v2619_v37 = vld [vmem:[%s3370_s5 + $0xd0] sm:$0xff]  }
 0x118   :  { %v2224_v45 = vpop.f32.mrf.mxu1  ;;  %v2282_v46 = vpop.f32.mrf.mxu0 }
 0x119   :  { %v2225_v49 = vadd.f32 %v2224_v45, %v2223_v39  ;;  %v943_v50 = vpack.c.bf16 %v932_v42, %v931_v25  ;;  %2311 = vmatpush3.bf16.msra.mxu1 %v2602_v38  ;;  %2369 = vmatpush3.bf16.msra.mxu0 %v2604_v41  ;;  %v892_v55 = vadd.f32 %v2280_v48, %v804_v43  ;;  %v2618_v42 = vld [vmem:[%s3370_s5 + $0x10] sm:$0xff]  }
 0x11a   :  { %v2226_v53 = vpop.f32.mrf.mxu1  ;;  %v2284_v54 = vpop.f32.mrf.mxu0  ;;  %2312 = vmatprep.subr.bf16.mxu1 %v2605_v23  ;;  %v2283_v57 = vadd.f32 %v2282_v46, %v2281_v40  ;;  %2370 = vmatprep.subr.bf16.mxu0 %v2607_v52  ;;  %v732_v38 = vadd.f32 %v3045_v4, %v3074_v32  ;;  %v2179_v41 = vadd.f32 %v3049_v8, %v3047_v6  ;;  %v2620_v4 = vld [vmem:[%s3370_s5 + $0x90] sm:$0xff]   ;;  %v2621_v6 = vld [vmem:[%s3370_s5 + $0x48] sm:$0xff]  }
 0x11b   :  { %v807_v56 = vadd.f32 %v2225_v49, %v719_v47  ;;  %1206 = vmatmul.mubr.bf16.gmra.mxu1 %v943_v50  ;;  %1307 = vmatmul.mubr.bf16.gmra.mxu0 %v943_v50  ;;  %v933_v30 = vmax.f32 %v892_v55, 0.0 }
 0x11c   :  { %v2227_v60 = vpop.f32.mrf.mxu1  ;;  %v2285_v62 = vpop.f32.mrf.mxu0  ;;  %1215 = vmatprep.mubr.bf16.mxu1 %v2629_v61  ;;  %1316 = vmatprep.mubr.bf16.mxu0 %v2629_v61  ;;  %v735_v49 = vadd.f32 %v2179_v41, %v3074_v32  ;;  %v2624_v41 = vld [vmem:[%s3370_s5 + $0x88] sm:$0xff]  }
 0x11d   :  { %v895_v0 = vadd.f32 %v2283_v57, %v807_v56  ;;  %v2228_v1 = vadd.f32 %v2227_v60, %v2226_v53  ;;  %2313 = vmatpush3.bf16.msra.mxu1 %v2606_v51  ;;  %2371 = vmatpush3.bf16.msra.mxu0 %v2608_v27  ;;  %v2286_v16 = vadd.f32 %v2285_v62, %v2284_v54 }
 0x11e   :  { %v2229_v3 = vpop.f32.mrf.mxu1  ;;  %v2287_v5 = vpop.f32.mrf.mxu0  ;;  %2314 = vmatprep.subr.bf16.mxu1 %v2609_v28  ;;  %2372 = vmatprep.subr.bf16.mxu0 %v2611_v58  ;;  %v740_v58 = vadd.f32 %v3051_v13, %v3074_v32 }
 0x11f   :  { %v934_v9 = vmax.f32 %v895_v0, 0.0  ;;  %v812_v10 = vadd.f32 %v2228_v1, %v724_v59  ;;  %v2185_v59 = vadd.f32 %v3055_v17, %v3053_v15 }
 0x120   :  { %v2230_v11 = vpop.f32.mrf.mxu1  ;;  %v2288_v12 = vpop.f32.mrf.mxu0 }
 0x121   :  { %v2231_v19 = vadd.f32 %v2230_v11, %v2229_v3  ;;  %v944_v18 = vpack.c.bf16 %v934_v9, %v933_v30  ;;  %2315 = vmatpush3.bf16.msra.mxu1 %v2610_v2  ;;  %2373 = vmatpush3.bf16.msra.mxu0 %v2612_v7  ;;  %v900_v34 = vadd.f32 %v2286_v16, %v812_v10 }
 0x122   :  { %v2232_v24 = vpop.f32.mrf.mxu1  ;;  %v2290_v26 = vpop.f32.mrf.mxu0  ;;  %2316 = vmatprep.subr.bf16.mxu1 %v2613_v29  ;;  %v2289_v36 = vadd.f32 %v2288_v12, %v2287_v5  ;;  %2374 = vmatprep.subr.bf16.mxu0 %v2615_v21  ;;  %v743_v29 = vadd.f32 %v2185_v59, %v3074_v32 }
 0x123   :  { %v815_v35 = vadd.f32 %v2231_v19, %v727_v14  ;;  %1216 = vmatmul.mubr.bf16.gmra.mxu1 %v944_v18  ;;  %1317 = vmatmul.mubr.bf16.gmra.mxu0 %v944_v18  ;;  %v935_v8 = vmax.f32 %v900_v34, 0.0  ;;  %v748_v19 = vadd.f32 %v3057_v22, %v3074_v32  ;;  %v2622_v32 = vld [vmem:[%s3370_s5 + $0x8] sm:$0xff]  }
 0x124   :  { %v2233_v39 = vpop.f32.mrf.mxu1  ;;  %v2291_v40 = vpop.f32.mrf.mxu0  ;;  %1225 = vmatprep.mubr.bf16.mxu1 %v2629_v61  ;;  %1326 = vmatprep.mubr.bf16.mxu0 %v2629_v61 }
 0x125   :  { %v903_v23 = vadd.f32 %v2289_v36, %v815_v35  ;;  %v2234_v25 = vadd.f32 %v2233_v39, %v2232_v24  ;;  %2317 = vmatpush3.bf16.msra.mxu1 %v2614_v20  ;;  %2375 = vmatpush3.bf16.msra.mxu0 %v2616_v31  ;;  %v2292_v50 = vadd.f32 %v2291_v40, %v2290_v26  ;;  %v2623_v40 = vld [vmem:[%s3370_s5 + $0xc8] sm:$0xff]  }
 0x126   :  { %v2235_v43 = vpop.f32.mrf.mxu1  ;;  %v2293_v44 = vpop.f32.mrf.mxu0  ;;  %2318 = vmatprep.subr.bf16.mxu1 %v2617_v33  ;;  %2376 = vmatprep.subr.bf16.mxu0 %v2619_v37 }
 0x127   :  { %v936_v45 = vmax.f32 %v903_v23, 0.0  ;;  %v820_v46 = vadd.f32 %v2234_v25, %v732_v38  ;;  %v2626_v23 = vld [vmem:[%s3370_s5] sm:$0xff]  }
 0x128   :  { %v2236_v47 = vpop.f32.mrf.mxu1  ;;  %v2294_v48 = vpop.f32.mrf.mxu0  ;;  %v2627_v25 = vld [vmem:[%s3370_s5 + $0xc0] sm:$0xff]  }
 0x129   :  { %v2237_v51 = vadd.f32 %v2236_v47, %v2235_v43  ;;  %v945_v52 = vpack.c.bf16 %v936_v45, %v935_v8  ;;  %2319 = vmatpush3.bf16.msra.mxu1 %v2618_v42  ;;  %2377 = vmatpush3.bf16.msra.mxu0 %v2620_v4  ;;  %v908_v27 = vadd.f32 %v2292_v50, %v820_v46  ;;  %v2628_v42 = vld [vmem:[%s3370_s5 + $0x80] sm:$0xff]   ;;  %v983_v43 = vlaneseq }
 0x12a   :  { %v2238_v53 = vpop.f32.mrf.mxu1  ;;  %v2296_v54 = vpop.f32.mrf.mxu0  ;;  %2320 = vmatprep.subr.bf16.mxu1 %v2621_v6  ;;  %v2295_v55 = vadd.f32 %v2294_v48, %v2293_v44  ;;  %2378 = vmatprep.subr.bf16.mxu0 %v2623_v40  ;;  %v981_v46 = vld [vmem:[%s3372_s4] sm:$0xf] }
 0x12b   :  { %v823_v28 = vadd.f32 %v2237_v51, %v735_v49  ;;  %1226 = vmatmul.mubr.bf16.gmra.mxu1 %v945_v52  ;;  %1327 = vmatmul.mubr.bf16.gmra.mxu0 %v945_v52  ;;  %v937_v1 = vmax.f32 %v908_v27, 0.0  ;;  %v3204_v44 = vshrl.u32 %v983_v43, 7 }
 0x12c   :  { %v2239_v56 = vpop.f32.mrf.mxu1  ;;  %v2297_v57 = vpop.f32.mrf.mxu0  ;;  %1235 = vmatprep.mubr.bf16.mxu1 %v2629_v61  ;;  %1336 = vmatprep.mubr.bf16.mxu0 %v2629_v61 }
 0x12d   :  { %v911_v60 = vadd.f32 %v2295_v55, %v823_v28  ;;  %v2240_v62 = vadd.f32 %v2239_v56, %v2238_v53  ;;  %v2298_v30 = vadd.f32 %v2297_v57, %v2296_v54  ;;  %2321 = vmatpush3.bf16.msra.mxu1 %v2622_v32  ;;  %2379 = vmatpush3.bf16.msra.mxu0 %v2624_v41  ;;  %v989_v4 = vsub.s32 1, %v3204_v44 }
 0x12e   :  { %v2241_v63 = vpop.f32.mrf.mxu1  ;;  %v2299_v0 = vpop.f32.mrf.mxu0  ;;  %2380 = vmatprep.subr.bf16.mxu0 %v2627_v25  ;;  %v997_v6 = vsub.s32 3, %v3204_v44  ;;  %v985_v8 = vsub.s32 0, %v3204_v44  ;;  %v993_v45 = vsub.s32 2, %v3204_v44 }
 0x12f   :  { %v938_v2 = vmax.f32 %v911_v60, 0.0  ;;  %v828_v3 = vadd.f32 %v2240_v62, %v740_v58  ;;  %v3213_v49 = vrot.slane %v981_v46, %v989_v4 }
 0x130   :  { %v2242_v5 = vpop.f32.mrf.mxu1  ;;  %v2300_v7 = vpop.f32.mrf.mxu0  ;;  %v3215_v50 = vrot.slane %v981_v46, %v997_v6  ;;  %v3219_v51 = vrot.slane %v981_v46, %v985_v8  ;;  %v3221_v52 = vrot.slane %v981_v46, %v993_v45 }
 0x131   :  { %v2243_v9 = vadd.f32 %v2242_v5, %v2241_v63  ;;  %v946_v10 = vpack.c.bf16 %v938_v2, %v937_v1  ;;  %v916_v13 = vadd.f32 %v2298_v30, %v828_v3  ;;  %v2301_v16 = vadd.f32 %v2300_v7, %v2299_v0  ;;  %2381 = vmatpush3.bf16.msra.mxu0 %v2628_v42 }
 0x132   :  { %v2244_v11 = vpop.f32.mrf.mxu1  ;;  %v2302_v12 = vpop.f32.mrf.mxu0 }
 0x133   :  { %v831_v14 = vadd.f32 %v2243_v9, %v743_v29  ;;  %1236 = vmatmul.mubr.bf16.gmra.mxu1 %v946_v10  ;;  %1337 = vmatmul.mubr.bf16.gmra.mxu0 %v946_v10  ;;  %v939_v31 = vmax.f32 %v916_v13, 0.0 }
 0x134   :  { %v2245_v15 = vpop.f32.mrf.mxu1  ;;  %v2303_v17 = vpop.f32.mrf.mxu0  ;;  %1245 = vmatprep.mubr.bf16.mxu1 %v2629_v61  ;;  %1346 = vmatprep.mubr.bf16.mxu0 %v2629_v61 }
 0x135   :  { %v919_v18 = vadd.f32 %v2301_v16, %v831_v14  ;;  %v2246_v20 = vadd.f32 %v2245_v15, %v2244_v11  ;;  %v2304_v21 = vadd.f32 %v2303_v17, %v2302_v12 }
 0x136   :  { %v2247_v24 = vpop.f32.mrf.mxu1  ;;  %v2305_v26 = vpop.f32.mrf.mxu0 }
 0x137   :  { %v940_v33 = vmax.f32 %v919_v18, 0.0  ;;  %v836_v34 = vadd.f32 %v2246_v20, %v748_v19 }
 0x138   :  { %v2248_v35 = vpop.f32.mrf.mxu1  ;;  %v2306_v36 = vpop.f32.mrf.mxu0 }
 0x139   :  { %v924_v37 = vadd.f32 %v2304_v21, %v836_v34  ;;  %v947_v38 = vpack.c.bf16 %v940_v33, %v939_v31 }
 0x13b   :  { %1246 = vmatmul.mubr.bf16.gmra.mxu1 %v947_v38  ;;  %1347 = vmatmul.mubr.bf16.gmra.mxu0 %v947_v38  ;;  %v941_v39 = vmax.f32 %v924_v37, 0.0 }
 0x13c   :  { %1255 = vmatprep.mubr.bf16.mxu1 %v2629_v61  ;;  %1356 = vmatprep.mubr.bf16.mxu0 %v2629_v61  ;;  %v2625_v61 = vld [vmem:[%s3370_s5 + $0x40] sm:$0xff]  }
 0x13d   :  { %v948_v22 = vpack.c.bf16 %v941_v39, %v941_v39  ;;  %2322 = vmatprep.subr.bf16.mxu1 %v2625_v61 }
 0x13e   :  { %2323 = vmatpush3.bf16.msra.mxu1 %v2626_v23 }
 0x143   :  { %1256 = vmatmul.mubr.bf16.gmra.mxu1 %v948_v22  ;;  %1357 = vmatmul.mubr.bf16.gmra.mxu0 %v948_v22 }
 0x1d3   :  { %v1197_v47 = vpop.f32.mrf.mxu1  ;;  %v1298_v48 = vpop.f32.mrf.mxu0 }
 0x1d4   :  { %v1198_v59 = vadd.f32 %v1197_v47, %v3219_v51  ;;  %v1299_v60 = vadd.f32 %v1298_v48, %v3221_v52 }
 0x1d5   :  { %v1199_v53 = vpop.f32.mrf.mxu1  ;;  %v1300_v54 = vpop.f32.mrf.mxu0 }
 0x1d6   :  { %v1200_v55 = vadd.f32 %v1199_v53, %v3213_v49  ;;  %v1301_v56 = vadd.f32 %v1300_v54, %v3215_v50  ;;  %v1365_v11 = vmax.f32 %v1198_v59, 0.0  ;;  %v1367_v12 = vmax.f32 %v1299_v60, 0.0 }
 0x1d7   :  { %v1201_v27 = vpop.f32.mrf.mxu1  ;;  %v1302_v28 = vpop.f32.mrf.mxu0 }
 0x1d8   :  { %v1202_v57 = vadd.f32 %v1201_v27, %v3219_v51  ;;  %v1303_v58 = vadd.f32 %v1302_v28, %v3221_v52  ;;  %v1366_v29 = vmax.f32 %v1200_v55, 0.0  ;;  %v1368_v30 = vmax.f32 %v1301_v56, 0.0 }
 0x1d9   :  { %v1203_v62 = vpop.f32.mrf.mxu1  ;;  %v1304_v63 = vpop.f32.mrf.mxu0 }
 0x1da   :  { %v1204_v0 = vadd.f32 %v1203_v62, %v3213_v49  ;;  %v1305_v1 = vadd.f32 %v1304_v63, %v3215_v50  ;;  %v1369_v2 = vmax.f32 %v1202_v57, 0.0  ;;  %v1371_v3 = vmax.f32 %v1303_v58, 0.0 }
 0x1db   :  { %v1207_v5 = vpop.f32.mrf.mxu1  ;;  %v1308_v7 = vpop.f32.mrf.mxu0 }
 0x1dc   :  { %v1370_v9 = vmax.f32 %v1204_v0, 0.0  ;;  %v1372_v10 = vmax.f32 %v1305_v1, 0.0  ;;  %v1417_v17 = vpack.c.bf16 %v1369_v2, %v1365_v11  ;;  %v1419_v19 = vpack.c.bf16 %v1371_v3, %v1367_v12 }
 0x1dd   :  { %v1209_v13 = vpop.f32.mrf.mxu1  ;;  %v1310_v14 = vpop.f32.mrf.mxu0  ;;  %v1208_v33 = vadd.f32 %v1207_v5, %v3219_v51  ;;  %v1309_v34 = vadd.f32 %v1308_v7, %v3221_v52 }
 0x1de   :  { %v1418_v16 = vpack.c.bf16 %v1370_v9, %v1366_v29  ;;  %v1420_v15 = vpack.c.bf16 %v1372_v10, %v1368_v30  ;;  %v1210_v18 = vadd.f32 %v1209_v13, %v3213_v49  ;;  %v1311_v24 = vadd.f32 %v1310_v14, %v3215_v50 }
 0x1df   :  { %v1211_v20 = vpop.f32.mrf.mxu1  ;;  %v1312_v21 = vpop.f32.mrf.mxu0  ;;  %v1373_v42 = vmax.f32 %v1208_v33, 0.0  ;;  %v1375_v43 = vmax.f32 %v1309_v34, 0.0 }
 0x1e0   :  { %v1212_v26 = vadd.f32 %v1211_v20, %v3219_v51  ;;  %v1313_v31 = vadd.f32 %v1312_v21, %v3221_v52  ;;  %1740 = vmatprep.mubr.bf16.mxu1 %v1418_v16  ;;  %1828 = vmatprep.mubr.bf16.mxu0 %v1420_v15  ;;  %v1374_v41 = vmax.f32 %v1210_v18, 0.0  ;;  %v1376_v61 = vmax.f32 %v1311_v24, 0.0 }
 0x1e1   :  { %v1213_v35 = vpop.f32.mrf.mxu1  ;;  %v1314_v36 = vpop.f32.mrf.mxu0  ;;  %1741 = vmatmul.mubr.bf16.vlgmr.msra.gmra.mxu1 %v1417_v17  ;;  %1829 = vmatmul.mubr.bf16.vlgmr.msra.gmra.mxu0 %v1419_v19 }
 0x1e2   :  { %v1214_v37 = vadd.f32 %v1213_v35, %v3213_v49  ;;  %v1315_v38 = vadd.f32 %v1314_v36, %v3215_v50  ;;  %v1377_v39 = vmax.f32 %v1212_v26, 0.0  ;;  %v1379_v22 = vmax.f32 %v1313_v31, 0.0 }
 0x1e3   :  { %v1217_v32 = vpop.f32.mrf.mxu1  ;;  %v1318_v40 = vpop.f32.mrf.mxu0 }
 0x1e4   :  { %v1378_v23 = vmax.f32 %v1214_v37, 0.0  ;;  %v1380_v25 = vmax.f32 %v1315_v38, 0.0  ;;  %v1421_v47 = vpack.c.bf16 %v1377_v39, %v1373_v42  ;;  %v1423_v48 = vpack.c.bf16 %v1379_v22, %v1375_v43 }
 0x1e5   :  { %v1219_v4 = vpop.f32.mrf.mxu1  ;;  %v1320_v6 = vpop.f32.mrf.mxu0  ;;  %v1218_v57 = vadd.f32 %v1217_v32, %v3219_v51  ;;  %v1319_v58 = vadd.f32 %v1318_v40, %v3221_v52 }
 0x1e6   :  { %v1422_v45 = vpack.c.bf16 %v1378_v23, %v1374_v41  ;;  %v1424_v46 = vpack.c.bf16 %v1380_v25, %v1376_v61  ;;  %v1220_v53 = vadd.f32 %v1219_v4, %v3213_v49  ;;  %v1321_v28 = vadd.f32 %v1320_v6, %v3215_v50 }
 0x1e7   :  { %v1221_v54 = vpop.f32.mrf.mxu1  ;;  %v1322_v27 = vpop.f32.mrf.mxu0  ;;  %v1381_v9 = vmax.f32 %v1218_v57, 0.0  ;;  %v1383_v10 = vmax.f32 %v1319_v58, 0.0 }
 0x1e8   :  { %v1222_v55 = vadd.f32 %v1221_v54, %v3219_v51  ;;  %v1323_v56 = vadd.f32 %v1322_v27, %v3221_v52  ;;  %1748 = vmatprep.mubr.bf16.mxu1 %v1422_v45  ;;  %1836 = vmatprep.mubr.bf16.mxu0 %v1424_v46  ;;  %v1382_v5 = vmax.f32 %v1220_v53, 0.0  ;;  %v1384_v7 = vmax.f32 %v1321_v28, 0.0 }
 0x1e9   :  { %v1223_v59 = vpop.f32.mrf.mxu1  ;;  %v1324_v60 = vpop.f32.mrf.mxu0  ;;  %1749 = vmatmul.mubr.bf16.gmra.mxu1 %v1421_v47  ;;  %1837 = vmatmul.mubr.bf16.gmra.mxu0 %v1423_v48 }
 0x1ea   :  { %v1224_v62 = vadd.f32 %v1223_v59, %v3213_v49  ;;  %v1325_v63 = vadd.f32 %v1324_v60, %v3215_v50  ;;  %v1385_v0 = vmax.f32 %v1222_v55, 0.0  ;;  %v1387_v1 = vmax.f32 %v1323_v56, 0.0 }
 0x1eb   :  { %v1227_v2 = vpop.f32.mrf.mxu1  ;;  %v1328_v3 = vpop.f32.mrf.mxu0 }
 0x1ec   :  { %v1386_v29 = vmax.f32 %v1224_v62, 0.0  ;;  %v1388_v30 = vmax.f32 %v1325_v63, 0.0  ;;  %v1425_v16 = vpack.c.bf16 %v1385_v0, %v1381_v9  ;;  %v1427_v15 = vpack.c.bf16 %v1387_v1, %v1383_v10 }
 0x1ed   :  { %v1229_v11 = vpop.f32.mrf.mxu1  ;;  %v1330_v12 = vpop.f32.mrf.mxu0  ;;  %v1228_v26 = vadd.f32 %v1227_v2, %v3219_v51  ;;  %v1329_v31 = vadd.f32 %v1328_v3, %v3221_v52 }
 0x1ee   :  { %v1426_v13 = vpack.c.bf16 %v1386_v29, %v1382_v5  ;;  %v1428_v14 = vpack.c.bf16 %v1388_v30, %v1384_v7  ;;  %v1230_v17 = vadd.f32 %v1229_v11, %v3213_v49  ;;  %v1331_v20 = vadd.f32 %v1330_v12, %v3215_v50 }
 0x1ef   :  { %v1231_v19 = vpop.f32.mrf.mxu1  ;;  %v1332_v18 = vpop.f32.mrf.mxu0  ;;  %v1389_v23 = vmax.f32 %v1228_v26, 0.0  ;;  %v1391_v25 = vmax.f32 %v1329_v31, 0.0 }
 0x1f0   :  { %v1232_v21 = vadd.f32 %v1231_v19, %v3219_v51  ;;  %v1333_v24 = vadd.f32 %v1332_v18, %v3221_v52  ;;  %1756 = vmatprep.mubr.bf16.mxu1 %v1426_v13  ;;  %1844 = vmatprep.mubr.bf16.mxu0 %v1428_v14  ;;  %v1390_v32 = vmax.f32 %v1230_v17, 0.0  ;;  %v1392_v40 = vmax.f32 %v1331_v20, 0.0 }
 0x1f1   :  { %v1233_v33 = vpop.f32.mrf.mxu1  ;;  %v1334_v34 = vpop.f32.mrf.mxu0  ;;  %1757 = vmatmul.mubr.bf16.gmra.mxu1 %v1425_v16  ;;  %1845 = vmatmul.mubr.bf16.gmra.mxu0 %v1427_v15 }
 0x1f2   :  { %v1234_v35 = vadd.f32 %v1233_v33, %v3213_v49  ;;  %v1335_v36 = vadd.f32 %v1334_v34, %v3215_v50  ;;  %v1393_v37 = vmax.f32 %v1232_v21, 0.0  ;;  %v1395_v38 = vmax.f32 %v1333_v24, 0.0 }
 0x1f3   :  { %v1237_v39 = vpop.f32.mrf.mxu1  ;;  %v1338_v22 = vpop.f32.mrf.mxu0 }
 0x1f4   :  { %v1394_v41 = vmax.f32 %v1234_v35, 0.0  ;;  %v1396_v61 = vmax.f32 %v1335_v36, 0.0  ;;  %v1429_v45 = vpack.c.bf16 %v1393_v37, %v1389_v23  ;;  %v1431_v46 = vpack.c.bf16 %v1395_v38, %v1391_v25 }
 0x1f5   :  { %v1239_v42 = vpop.f32.mrf.mxu1  ;;  %v1340_v43 = vpop.f32.mrf.mxu0  ;;  %v1238_v55 = vadd.f32 %v1237_v39, %v3219_v51  ;;  %v1339_v56 = vadd.f32 %v1338_v22, %v3221_v52 }
 0x1f6   :  { %v1430_v4 = vpack.c.bf16 %v1394_v41, %v1390_v32  ;;  %v1432_v6 = vpack.c.bf16 %v1396_v61, %v1392_v40  ;;  %v1240_v47 = vadd.f32 %v1239_v42, %v3213_v49  ;;  %v1341_v54 = vadd.f32 %v1340_v43, %v3215_v50 }
 0x1f7   :  { %v1241_v48 = vpop.f32.mrf.mxu1  ;;  %v1342_v53 = vpop.f32.mrf.mxu0  ;;  %v1397_v29 = vmax.f32 %v1238_v55, 0.0  ;;  %v1399_v30 = vmax.f32 %v1339_v56, 0.0 }
 0x1f8   :  { %v1242_v27 = vadd.f32 %v1241_v48, %v3219_v51  ;;  %v1343_v28 = vadd.f32 %v1342_v53, %v3221_v52  ;;  %1764 = vmatprep.mubr.bf16.mxu1 %v1430_v4  ;;  %1852 = vmatprep.mubr.bf16.mxu0 %v1432_v6  ;;  %v1398_v2 = vmax.f32 %v1240_v47, 0.0  ;;  %v1400_v3 = vmax.f32 %v1341_v54, 0.0 }
 0x1f9   :  { %v1243_v57 = vpop.f32.mrf.mxu1  ;;  %v1344_v58 = vpop.f32.mrf.mxu0  ;;  %1765 = vmatmul.mubr.bf16.gmra.mxu1 %v1429_v45  ;;  %1853 = vmatmul.mubr.bf16.gmra.mxu0 %v1431_v46 }
 0x1fa   :  { %v1244_v59 = vadd.f32 %v1243_v57, %v3213_v49  ;;  %v1345_v60 = vadd.f32 %v1344_v58, %v3215_v50  ;;  %v1401_v62 = vmax.f32 %v1242_v27, 0.0  ;;  %v1403_v63 = vmax.f32 %v1343_v28, 0.0 }
 0x1fb   :  { %v1247_v0 = vpop.f32.mrf.mxu1  ;;  %v1348_v1 = vpop.f32.mrf.mxu0 }
 0x1fc   :  { %v1402_v5 = vmax.f32 %v1244_v59, 0.0  ;;  %v1404_v7 = vmax.f32 %v1345_v60, 0.0  ;;  %v1433_v13 = vpack.c.bf16 %v1401_v62, %v1397_v29  ;;  %v1435_v14 = vpack.c.bf16 %v1403_v63, %v1399_v30  ;;  %v1897_v62 = vld [vmem:[%s3373_s7] sm:$0x1] }
 0x1fd   :  { %v1249_v9 = vpop.f32.mrf.mxu1  ;;  %v1350_v10 = vpop.f32.mrf.mxu0  ;;  %v1248_v21 = vadd.f32 %v1247_v0, %v3219_v51  ;;  %v1349_v24 = vadd.f32 %v1348_v1, %v3221_v52  ;;  %v3281_v63 = vld [vmem:[%s3374_s6] ss:$0 sm:$0xff] }
 0x1fe   :  { %v1434_v11 = vpack.c.bf16 %v1402_v5, %v1398_v2  ;;  %v1436_v12 = vpack.c.bf16 %v1404_v7, %v1400_v3  ;;  %v1250_v16 = vadd.f32 %v1249_v9, %v3213_v49  ;;  %v1351_v19 = vadd.f32 %v1350_v10, %v3215_v50 }
 0x1ff   :  { %v1251_v15 = vpop.f32.mrf.mxu1  ;;  %v1352_v17 = vpop.f32.mrf.mxu0  ;;  %v1405_v41 = vmax.f32 %v1248_v21, 0.0  ;;  %v1407_v61 = vmax.f32 %v1349_v24, 0.0  ;;  %v1898_v3 = vunpack.c.l.bf16 %v1897_v62 }
 0x200   :  { %v1252_v18 = vadd.f32 %v1251_v15, %v3219_v51  ;;  %v1353_v20 = vadd.f32 %v1352_v17, %v3221_v52  ;;  %1772 = vmatprep.mubr.bf16.mxu1 %v1434_v11  ;;  %1860 = vmatprep.mubr.bf16.mxu0 %v1436_v12  ;;  %v1406_v39 = vmax.f32 %v1250_v16, 0.0  ;;  %v1408_v22 = vmax.f32 %v1351_v19, 0.0 }
 0x201   :  { %v1253_v26 = vpop.f32.mrf.mxu1  ;;  %v1354_v31 = vpop.f32.mrf.mxu0  ;;  %1773 = vmatmul.mubr.bf16.gmra.mxu1 %v1433_v13  ;;  %1861 = vmatmul.mubr.bf16.gmra.mxu0 %v1435_v14  ;;  %v3286_v13 = vrot.slane %v1898_v3, %v985_v8 }
 0x202   :  { %v1254_v33 = vadd.f32 %v1253_v26, %v3213_v49  ;;  %v1355_v34 = vadd.f32 %v1354_v31, %v3215_v50  ;;  %v1409_v35 = vmax.f32 %v1252_v18, 0.0  ;;  %v1411_v36 = vmax.f32 %v1353_v20, 0.0 }
 0x203   :  { %v1257_v37 = vpop.f32.mrf.mxu1  ;;  %v1358_v38 = vpop.f32.mrf.mxu0 }
 0x204   :  { %v1410_v32 = vmax.f32 %v1254_v33, 0.0  ;;  %v1412_v40 = vmax.f32 %v1355_v34, 0.0  ;;  %v1437_v45 = vpack.c.bf16 %v1409_v35, %v1405_v41  ;;  %v1439_v46 = vpack.c.bf16 %v1411_v36, %v1407_v61 }
 0x205   :  { %v1259_v23 = vpop.f32.mrf.mxu1  ;;  %v1360_v25 = vpop.f32.mrf.mxu0  ;;  %v1258_v47 = vadd.f32 %v1257_v37, %v3219_v51  ;;  %v1359_v48 = vadd.f32 %v1358_v38, %v3221_v52 }
 0x206   :  { %v1438_v42 = vpack.c.bf16 %v1410_v32, %v1406_v39  ;;  %v1440_v43 = vpack.c.bf16 %v1412_v40, %v1408_v22  ;;  %v1260_v4 = vadd.f32 %v1259_v23, %v3213_v49  ;;  %v1361_v6 = vadd.f32 %v1360_v25, %v3215_v50 }
 0x207   :  { %v1261_v53 = vpop.f32.mrf.mxu1  ;;  %v1362_v54 = vpop.f32.mrf.mxu0  ;;  %v1413_v58 = vmax.f32 %v1258_v47, 0.0  ;;  %v1415_v50 = vmax.f32 %v1359_v48, 0.0 }
 0x208   :  { %v1414_v27 = vmax.f32 %v1260_v4, 0.0  ;;  %v1416_v28 = vmax.f32 %v1361_v6, 0.0  ;;  %1780 = vmatprep.mubr.bf16.mxu1 %v1438_v42  ;;  %1868 = vmatprep.mubr.bf16.mxu0 %v1440_v43 }
 0x209   :  { %v1262_v55 = vpop.f32.mrf.mxu1  ;;  %v1363_v56 = vpop.f32.mrf.mxu0  ;;  %1781 = vmatmul.mubr.bf16.gmra.mxu1 %v1437_v45  ;;  %1869 = vmatmul.mubr.bf16.gmra.mxu0 %v1439_v46  ;;  %v1441_v59 = vpack.c.bf16 %v1413_v58, %v1413_v58  ;;  %v1443_v51 = vpack.c.bf16 %v1415_v50, %v1415_v50 }
 0x20a   :  { %v1442_v57 = vpack.c.bf16 %v1414_v27, %v1414_v27  ;;  %v1444_v49 = vpack.c.bf16 %v1416_v28, %v1416_v28 }
 0x20c   :  { %1788 = vmatprep.mubr.bf16.mxu1 %v1442_v57  ;;  %1876 = vmatprep.mubr.bf16.mxu0 %v1444_v49 }
 0x211   :  { %1789 = vmatmul.mubr.bf16.gmra.mxu1 %v1441_v59  ;;  %1877 = vmatmul.mubr.bf16.gmra.mxu0 %v1443_v51 }
 0x2a1   :  { %v2324_v52 = vpop.f32.mrf.mxu1  ;;  %v2382_v60 = vpop.f32.mrf.mxu0 }
 0x2a3   :  { %v2325_v0 = vpop.f32.mrf.mxu1  ;;  %v2383_v1 = vpop.f32.mrf.mxu0 }
 0x2a4   :  { %v2326_v2 = vadd.f32 %v2325_v0, %v2324_v52  ;;  %v2384_v30 = vadd.f32 %v2383_v1, %v2382_v60 }
 0x2a5   :  { %v2327_v5 = vpop.f32.mrf.mxu1  ;;  %v2385_v7 = vpop.f32.mrf.mxu0 }
 0x2a6   :  { %v1743_v29 = vadd.f32 %v2326_v2, %v3281_v63 }
 0x2a7   :  { %v2328_v9 = vpop.f32.mrf.mxu1  ;;  %v2386_v10 = vpop.f32.mrf.mxu0 }
 0x2a8   :  { %v2329_v11 = vadd.f32 %v2328_v9, %v2327_v5  ;;  %v1831_v12 = vadd.f32 %v2384_v30, %v1743_v29  ;;  %v2387_v17 = vadd.f32 %v2386_v10, %v2385_v7 }
 0x2a9   :  { %v2330_v14 = vpop.f32.mrf.mxu1  ;;  %v2388_v16 = vpop.f32.mrf.mxu0 }
 0x2aa   :  { %v1746_v15 = vadd.f32 %v2329_v11, %v3281_v63  ;;  %v1884_v19 = vmax.f32 %v1831_v12, 0.0 }
 0x2ab   :  { %v2331_v18 = vpop.f32.mrf.mxu1  ;;  %v2389_v20 = vpop.f32.mrf.mxu0 }
 0x2ac   :  { %v1834_v21 = vadd.f32 %v2387_v17, %v1746_v15  ;;  %v2332_v24 = vadd.f32 %v2331_v18, %v2330_v14  ;;  %v1903_v26 = vmul.f32 %v3286_v13, %v1884_v19  ;;  %v2390_v44 = vadd.f32 %v2389_v20, %v2388_v16 }
 0x2ad   :  { %v2333_v31 = vpop.f32.mrf.mxu1  ;;  %v2391_v33 = vpop.f32.mrf.mxu0 }
 0x2ae   :  { %v1885_v34 = vmax.f32 %v1834_v21, 0.0  ;;  %v1751_v35 = vadd.f32 %v2332_v24, %v3281_v63  ;;  %1916 = vadd.xlane.f32.xlu0 %v1903_v26 }
 0x2af   :  { %v2334_v8 = vpop.f32.mrf.mxu1  ;;  %v2392_v36 = vpop.f32.mrf.mxu0 }
 0x2b0   :  { %v2335_v37 = vadd.f32 %v2334_v8, %v2333_v31  ;;  %v1904_v38 = vmul.f32 %v3286_v13, %v1885_v34  ;;  %v1839_v39 = vadd.f32 %v2390_v44, %v1751_v35  ;;  %v2393_v41 = vadd.f32 %v2392_v36, %v2391_v33 }
 0x2b1   :  { %v2336_v22 = vpop.f32.mrf.mxu1  ;;  %v2394_v32 = vpop.f32.mrf.mxu0 }
 0x2b2   :  { %v1754_v40 = vadd.f32 %v2335_v37, %v3281_v63  ;;  %1918 = vadd.xlane.f32.xlu0 %v1904_v38  ;;  %v1886_v61 = vmax.f32 %v1839_v39, 0.0 }
 0x2b3   :  { %v2337_v23 = vpop.f32.mrf.mxu1  ;;  %v2395_v25 = vpop.f32.mrf.mxu0 }
 0x2b4   :  { %v1842_v42 = vadd.f32 %v2393_v41, %v1754_v40  ;;  %v2338_v43 = vadd.f32 %v2337_v23, %v2336_v22  ;;  %v1905_v4 = vmul.f32 %v3286_v13, %v1886_v61  ;;  %v2396_v48 = vadd.f32 %v2395_v25, %v2394_v32 }
 0x2b5   :  { %v2339_v6 = vpop.f32.mrf.mxu1  ;;  %v2397_v45 = vpop.f32.mrf.mxu0 }
 0x2b6   :  { %v1887_v46 = vmax.f32 %v1842_v42, 0.0  ;;  %v1759_v47 = vadd.f32 %v2338_v43, %v3281_v63  ;;  %1920 = vadd.xlane.f32.xlu1 %v1905_v4 }
 0x2b7   :  { %v2340_v53 = vpop.f32.mrf.mxu1  ;;  %v2398_v54 = vpop.f32.mrf.mxu0 }
 0x2b8   :  { %v1847_v27 = vadd.f32 %v2396_v48, %v1759_v47  ;;  %v2341_v28 = vadd.f32 %v2340_v53, %v2339_v6  ;;  %v1906_v55 = vmul.f32 %v3286_v13, %v1887_v46  ;;  %v2399_v50 = vadd.f32 %v2398_v54, %v2397_v45 }
 0x2b9   :  { %v2342_v56 = vpop.f32.mrf.mxu1  ;;  %v2400_v57 = vpop.f32.mrf.mxu0 }
 0x2ba   :  { %v1888_v49 = vmax.f32 %v1847_v27, 0.0  ;;  %v1762_v58 = vadd.f32 %v2341_v28, %v3281_v63  ;;  %1922 = vadd.xlane.f32.xlu1 %v1906_v55 }
 0x2bb   :  { %v2343_v59 = vpop.f32.mrf.mxu1  ;;  %v2401_v51 = vpop.f32.mrf.mxu0 }
 0x2bc   :  { %v1850_v52 = vadd.f32 %v2399_v50, %v1762_v58  ;;  %v2344_v60 = vadd.f32 %v2343_v59, %v2342_v56  ;;  %v1907_v62 = vmul.f32 %v3286_v13, %v1888_v49  ;;  %v2402_v5 = vadd.f32 %v2401_v51, %v2400_v57 }
 0x2bd   :  { %v2345_v0 = vpop.f32.mrf.mxu1  ;;  %v2403_v1 = vpop.f32.mrf.mxu0 }
 0x2be   :  { %v1889_v2 = vmax.f32 %v1850_v52, 0.0  ;;  %v1767_v3 = vadd.f32 %v2344_v60, %v3281_v63  ;;  %1924 = vadd.xlane.f32.xlu0 %v1907_v62 }
 0x2bf   :  { %v2346_v7 = vpop.f32.mrf.mxu1  ;;  %v2404_v29 = vpop.f32.mrf.mxu0 }
 0x2c0   :  { %v1855_v30 = vadd.f32 %v2402_v5, %v1767_v3  ;;  %v2347_v9 = vadd.f32 %v2346_v7, %v2345_v0  ;;  %v1908_v10 = vmul.f32 %v3286_v13, %v1889_v2  ;;  %v2405_v15 = vadd.f32 %v2404_v29, %v2403_v1 }
 0x2c1   :  { %v2348_v11 = vpop.f32.mrf.mxu1  ;;  %v2406_v12 = vpop.f32.mrf.mxu0 }
 0x2c2   :  { %v1890_v14 = vmax.f32 %v1855_v30, 0.0  ;;  %v1770_v16 = vadd.f32 %v2347_v9, %v3281_v63  ;;  %1926 = vadd.xlane.f32.xlu1 %v1908_v10 }
 0x2c3   :  { %v2349_v17 = vpop.f32.mrf.mxu1  ;;  %v2407_v19 = vpop.f32.mrf.mxu0 }
 0x2c4   :  { %v1858_v18 = vadd.f32 %v2405_v15, %v1770_v16  ;;  %v2350_v20 = vadd.f32 %v2349_v17, %v2348_v11  ;;  %v1909_v21 = vmul.f32 %v3286_v13, %v1890_v14  ;;  %v2408_v34 = vadd.f32 %v2407_v19, %v2406_v12 }
 0x2c5   :  { %v2351_v24 = vpop.f32.mrf.mxu1  ;;  %v2409_v26 = vpop.f32.mrf.mxu0  ;;  %v1945_v11 = vstv %s3375_s8 }
 0x2c6   :  { %v1891_v31 = vmax.f32 %v1858_v18, 0.0  ;;  %v1775_v33 = vadd.f32 %v2350_v20, %v3281_v63  ;;  %1928 = vadd.xlane.f32.xlu0 %v1909_v21 }
 0x2c7   :  { %v2352_v35 = vpop.f32.mrf.mxu1  ;;  %v2410_v44 = vpop.f32.mrf.mxu0 }
 0x2c8   :  { %v1863_v8 = vadd.f32 %v2408_v34, %v1775_v33  ;;  %v2353_v36 = vadd.f32 %v2352_v35, %v2351_v24  ;;  %v1910_v37 = vmul.f32 %v3286_v13, %v1891_v31  ;;  %v2411_v40 = vadd.f32 %v2410_v44, %v2409_v26 }
 0x2c9   :  { %v2354_v38 = vpop.f32.mrf.mxu1  ;;  %v2412_v39 = vpop.f32.mrf.mxu0 }
 0x2ca   :  { %v1892_v22 = vmax.f32 %v1863_v8, 0.0  ;;  %v1778_v32 = vadd.f32 %v2353_v36, %v3281_v63  ;;  %1930 = vadd.xlane.f32.xlu1 %v1910_v37 }
 0x2cb   :  { %v2355_v41 = vpop.f32.mrf.mxu1  ;;  %v2413_v61 = vpop.f32.mrf.mxu0 }
 0x2cc   :  { %v1866_v23 = vadd.f32 %v2411_v40, %v1778_v32  ;;  %v2356_v25 = vadd.f32 %v2355_v41, %v2354_v38  ;;  %v1911_v42 = vmul.f32 %v3286_v13, %v1892_v22  ;;  %v2414_v46 = vadd.f32 %v2413_v61, %v2412_v39 }
 0x2cd   :  { %v2357_v43 = vpop.f32.mrf.mxu1  ;;  %v2415_v4 = vpop.f32.mrf.mxu0 }
 0x2ce   :  { %v1893_v6 = vmax.f32 %v1866_v23, 0.0  ;;  %v1783_v45 = vadd.f32 %v2356_v25, %v3281_v63  ;;  %1932 = vadd.xlane.f32.xlu0 %v1911_v42 }
 0x2cf   :  { %v2358_v47 = vpop.f32.mrf.mxu1  ;;  %v2416_v48 = vpop.f32.mrf.mxu0 }
 0x2d0   :  { %v1871_v53 = vadd.f32 %v2414_v46, %v1783_v45  ;;  %v2359_v54 = vadd.f32 %v2358_v47, %v2357_v43  ;;  %v1912_v27 = vmul.f32 %v3286_v13, %v1893_v6  ;;  %v2417_v49 = vadd.f32 %v2416_v48, %v2415_v4 }
 0x2d1   :  { %v2360_v28 = vpop.f32.mrf.mxu1  ;;  %v2418_v55 = vpop.f32.mrf.mxu0 }
 0x2d2   :  { %v1894_v56 = vmax.f32 %v1871_v53, 0.0  ;;  %v1786_v57 = vadd.f32 %v2359_v54, %v3281_v63  ;;  %1934 = vadd.xlane.f32.xlu1 %v1912_v27 }
 0x2d3   :  { %v2361_v58 = vpop.f32.mrf.mxu1  ;;  %v2419_v50 = vpop.f32.mrf.mxu0 }
 0x2d4   :  { %v1874_v59 = vadd.f32 %v2417_v49, %v1786_v57  ;;  %v2362_v51 = vadd.f32 %v2361_v58, %v2360_v28  ;;  %v1913_v52 = vmul.f32 %v3286_v13, %v1894_v56  ;;  %v2420_v2 = vadd.f32 %v2419_v50, %v2418_v55 }
 0x2d5   :  { %v2363_v60 = vpop.f32.mrf.mxu1  ;;  %v2421_v62 = vpop.f32.mrf.mxu0 }
 0x2d6   :  { %v1895_v0 = vmax.f32 %v1874_v59, 0.0  ;;  %v1791_v1 = vadd.f32 %v2362_v51, %v3281_v63  ;;  %1936 = vadd.xlane.f32.xlu0 %v1913_v52 }
 0x2d7   :  { %v2364_v3 = vpop.f32.mrf.mxu1  ;;  %v2422_v5 = vpop.f32.mrf.mxu0 }
 0x2d8   :  { %v1879_v7 = vadd.f32 %v2420_v2, %v1791_v1  ;;  %v1914_v29 = vmul.f32 %v3286_v13, %v1895_v0 }
 0x2da   :  { %v1896_v30 = vmax.f32 %v1879_v7, 0.0  ;;  %1938 = vadd.xlane.f32.xlu1 %v1914_v29 }
 0x2dc   :  { %v1915_v9 = vmul.f32 %v3286_v13, %v1896_v30 }
 0x2de   :  { %v1941_v10 = vsel %vm1940_vm0, %v1915_v9, 0.0 }
 0x2df   :  { %1942 = vadd.xlane.f32.xlu0 %v1941_v10 }
 0x337   :  { %v1917_v63 = vpop.xlane.xlu0 %1916 }
 0x338   :  { %v1946_v12 = vadd.f32 %v1945_v11, %v1917_v63 }
 0x33a   :  { %1960 = vst.msk [vmem:[%s3376_s9] sm:$0xff] %vm1959_vm1, %v1946_v12 }
 0x33b   :  { %v1919_v14 = vpop.xlane.xlu0 %1918 }
 0x33c   :  { %v1947_v16 = vadd.f32 %v1945_v11, %v1919_v14 }
 0x33e   :  { %1961 = vst.msk [vmem:[%s3376_s9 + $0x8] sm:$0xff] %vm1959_vm1, %v1947_v16 }
 0x33f   :  { %v1921_v13 = vpop.xlane.xlu1 %1920 }
 0x340   :  { %v1948_v15 = vadd.f32 %v1945_v11, %v1921_v13 }
 0x342   :  { %1962 = vst.msk [vmem:[%s3376_s9 + $0x10] sm:$0xff] %vm1959_vm1, %v1948_v15 }
 0x343   :  { %v1923_v17 = vpop.xlane.xlu1 %1922 }
 0x344   :  { %v1949_v19 = vadd.f32 %v1945_v11, %v1923_v17 }
 0x346   :  { %1963 = vst.msk [vmem:[%s3376_s9 + $0x18] sm:$0xff] %vm1959_vm1, %v1949_v19 }
 0x347   :  { %v1925_v18 = vpop.xlane.xlu0 %1924 }
 0x348   :  { %v1950_v20 = vadd.f32 %v1945_v11, %v1925_v18 }
 0x34a   :  { %1964 = vst.msk [vmem:[%s3376_s9 + $0x20] sm:$0xff] %vm1959_vm1, %v1950_v20 }
 0x34b   :  { %v1927_v21 = vpop.xlane.xlu1 %1926 }
 0x34c   :  { %v1951_v24 = vadd.f32 %v1945_v11, %v1927_v21 }
 0x34e   :  { %1965 = vst.msk [vmem:[%s3376_s9 + $0x28] sm:$0xff] %vm1959_vm1, %v1951_v24 }
 0x34f   :  { %v1929_v26 = vpop.xlane.xlu0 %1928 }
 0x350   :  { %v1952_v31 = vadd.f32 %v1945_v11, %v1929_v26 }
 0x352   :  { %1966 = vst.msk [vmem:[%s3376_s9 + $0x30] sm:$0xff] %vm1959_vm1, %v1952_v31 }
 0x353   :  { %v1931_v33 = vpop.xlane.xlu1 %1930 }
 0x354   :  { %v1953_v34 = vadd.f32 %v1945_v11, %v1931_v33 }
 0x356   :  { %1967 = vst.msk [vmem:[%s3376_s9 + $0x38] sm:$0xff] %vm1959_vm1, %v1953_v34 }
 0x357   :  { %v1933_v35 = vpop.xlane.xlu0 %1932 }
 0x358   :  { %v1954_v44 = vadd.f32 %v1945_v11, %v1933_v35 }
 0x35a   :  { %1968 = vst.msk [vmem:[%s3376_s9 + $0x40] sm:$0xff] %vm1959_vm1, %v1954_v44 }
 0x35b   :  { %v1935_v8 = vpop.xlane.xlu1 %1934 }
 0x35c   :  { %v1955_v36 = vadd.f32 %v1945_v11, %v1935_v8 }
 0x35e   :  { %1969 = vst.msk [vmem:[%s3376_s9 + $0x48] sm:$0xff] %vm1959_vm1, %v1955_v36 }
 0x35f   :  { %v1937_v37 = vpop.xlane.xlu0 %1936 }
 0x360   :  { %v1956_v38 = vadd.f32 %v1945_v11, %v1937_v37 }
 0x362   :  { %1970 = vst.msk [vmem:[%s3376_s9 + $0x50] sm:$0xff] %vm1959_vm1, %v1956_v38 }
 0x363   :  { %v1939_v39 = vpop.xlane.xlu1 %1938 }
 0x364   :  { %v1957_v22 = vadd.f32 %v1945_v11, %v1939_v39 }
 0x366   :  { %1971 = vst.msk [vmem:[%s3376_s9 + $0x58] sm:$0xff] %vm1959_vm1, %v1957_v22 }
 0x368   :  { %v1943_v32 = vpop.xlane.xlu0 %1942 }
 0x369   :  { %v1958_v40 = vadd.f32 %v1945_v11, %v1943_v32 }
 0x36b   :  { %1973 = vst.msk [vmem:[%s3376_s9 + $0x60] sm:$0xf] %vm1972_vm2, %v1958_v40 }

</bundles_post_ra>
